<compile_context>
chip_gen: v7x
topology: tpu7x:2x2x1
jax: 0.10.0
libtpu: 0.0.40
codegen_flags: <defaults>
</compile_context>

<pallas_src>
import functools

import jax
import jax.numpy as jnp
from jax.experimental import pallas as pl
from jax.experimental.pallas import tpu as pltpu

# ----------------------- small BERT-style config -----------------------
VOCAB = 100
HIDDEN = 32
NUM_HEADS = 4
HEAD_DIM = HIDDEN // NUM_HEADS
INTERMEDIATE = 64
NUM_LAYERS = 2
MAX_POS = 16
TYPE_VOCAB = 2
LN_EPS = 1e-12
NUM_LABELS_PER_COMPONENT = (5, 7, 3)          # num_labels_per_component
TOTAL_LABELS = sum(NUM_LABELS_PER_COMPONENT)  # 15
CLS_PAD = 128                                 # lane-dense padded classifier width

_VMEM = pl.BlockSpec(memory_space=pltpu.MemorySpace.VMEM)


# ------------------------- fused forward kernel --------------------------
def _fused_bert_kernel(ids_ref, mask_ref, word_emb_ref, pos_emb_ref, tok_emb_ref,
                       eln_g_ref, eln_b_ref,
                       qkv_w_ref, qkv_b_ref, o_w_ref, o_b_ref,
                       ln1_g_ref, ln1_b_ref, i_w_ref, i_b_ref,
                       f_w_ref, f_b_ref, ln2_g_ref, ln2_b_ref,
                       cls_w_ref, cls_b_ref,
                       out_ref, *, batch, seq):
    f32 = jnp.float32
    bf16 = jnp.bfloat16
    scale = 1.0 / (HEAD_DIM ** 0.5)
    tokens = batch * seq

    def layer_norm(x, g, b):
        mu = jnp.mean(x, axis=-1, keepdims=True)
        var = jnp.mean(jnp.square(x - mu), axis=-1, keepdims=True)
        return (x - mu) * jax.lax.rsqrt(var + LN_EPS) * g + b

    def gelu(x):
        # TODO(synk): HF BERT uses the exact erf GELU; tanh approximation used here for
        # portable Mosaic lowering (deviation ~1e-3).
        return 0.5 * x * (1.0 + jnp.tanh(0.7978845608028654 * (x + 0.044715 * x * x * x)))

    # ---- embeddings fully in-kernel: one-hot gather on the MXU (exact, f32) ----
    onehot = (jax.lax.broadcasted_iota(jnp.int32, (tokens, VOCAB), 1)
              == ids_ref[...]).astype(f32)                     # (T, VOCAB)
    word = jnp.dot(onehot, word_emb_ref[...], preferred_element_type=f32)
    pos = jnp.concatenate([pos_emb_ref[0:seq, :]] * batch, axis=0)
    emb = word + pos + tok_emb_ref[0:1, :]                     # token_type_ids all zero
    h = layer_norm(emb, eln_g_ref[...], eln_b_ref[...])        # (T, H) f32

    # ---- additive attention mask, broadcast ONCE for every (batch, head) tile ----
    mask_add = (1.0 - mask_ref[...].astype(f32)) * -1e9        # (B, S)
    mask_all = jnp.concatenate(
        [jnp.broadcast_to(mask_add[b:b + 1, :], (NUM_HEADS * seq, seq))
         for b in range(batch)], axis=0)                       # (B*H*S, S)

    # ---- encoder layers (static Python loop; all weights resident in VMEM) ----
    for l in range(NUM_LAYERS):
        # fused QKV projection: bf16 operands, f32 accumulation
        qkv = (jnp.dot(h.astype(bf16), qkv_w_ref[l], preferred_element_type=f32)
               + qkv_b_ref[l])                                 # (T, 3H) f32
        qkv16 = qkv.astype(bf16)                               # one cast per layer

        # all (batch, head) score tiles, then ONE batched softmax
        score_tiles = []
        for b in range(batch):
            r0 = b * seq
            for n in range(NUM_HEADS):
                c0 = n * HEAD_DIM
                q_bn = qkv16[r0:r0 + seq, c0:c0 + HEAD_DIM]
                k_bn = qkv16[r0:r0 + seq, HIDDEN + c0:HIDDEN + c0 + HEAD_DIM]
                score_tiles.append(jax.lax.dot_general(
                    q_bn, k_bn, (((1,), (1,)), ((), ())),
                    preferred_element_type=f32))               # (S, S) = q @ k^T
        s_all = jnp.concatenate(score_tiles, axis=0) * scale + mask_all   # (B*H*S, S)
        s_all = s_all - jnp.max(s_all, axis=-1, keepdims=True)
        p_all = jnp.exp(s_all)
        p_all = p_all * pl.reciprocal(jnp.sum(p_all, axis=-1, keepdims=True), approx=True)
        p16 = p_all.astype(bf16)

        # context kept in registers (no VMEM scratch): lane-concat heads, sublane-concat batches
        ctx_rows = []
        for b in range(batch):
            r0 = b * seq
            heads = []
            for n in range(NUM_HEADS):
                idx = b * NUM_HEADS + n
                c0 = n * HEAD_DIM
                p_bn = p16[idx * seq:(idx + 1) * seq, :]
                v_bn = qkv16[r0:r0 + seq, 2 * HIDDEN + c0:2 * HIDDEN + c0 + HEAD_DIM]
                heads.append(jnp.dot(p_bn, v_bn, preferred_element_type=f32))
            ctx_rows.append(jnp.concatenate(heads, axis=1))    # (S, H)
        ctx = jnp.concatenate(ctx_rows, axis=0)                # (T, H) f32

        # output projection + residual + LN
        attn_out = (jnp.dot(ctx.astype(bf16), o_w_ref[l], preferred_element_type=f32)
                    + o_b_ref[l])
        h = layer_norm(attn_out + h, ln1_g_ref[l], ln1_b_ref[l])

        # FFN (GELU) + residual + LN
        inter = gelu(jnp.dot(h.astype(bf16), i_w_ref[l], preferred_element_type=f32)
                     + i_b_ref[l])
        ffn_out = (jnp.dot(inter.astype(bf16), f_w_ref[l], preferred_element_type=f32)
                   + f_b_ref[l])
        h = layer_norm(ffn_out + h, ln2_g_ref[l], ln2_b_ref[l])

    # ---- fused classifier heads: gather [CLS] rows, ONE matmul, ONE lane-dense store ----
    cls = jnp.concatenate([h[b * seq:b * seq + 1, :] for b in range(batch)], axis=0)  # (B, H)
    out_ref[...] = (jnp.dot(cls.astype(bf16), cls_w_ref[...], preferred_element_type=f32)
                    + cls_b_ref[...])


# --------------------------- parameters ---------------------------------
def init_params(key):
    # TODO(synk): pretrained 'bert-base-multilingual-cased' weights are not loadable here;
    # parameters are deterministic synthetic inits with the same structural shapes.
    n_keys = 4 + NUM_LAYERS * 6 + len(NUM_LABELS_PER_COMPONENT)
    it = iter(jax.random.split(key, n_keys))

    def w(k, shape):
        return jax.random.normal(k, shape, jnp.float32) * 0.02

    params = {
        "word_emb": w(next(it), (VOCAB, HIDDEN)),
        "pos_emb": w(next(it), (MAX_POS, HIDDEN)),
        "tok_emb": w(next(it), (TYPE_VOCAB, HIDDEN)),
        "emb_ln_g": jnp.ones((HIDDEN,), jnp.float32),
        "emb_ln_b": jnp.zeros((HIDDEN,), jnp.float32),
        "layers": [],
        "classifiers": [],
    }
    for _ in range(NUM_LAYERS):
        params["layers"].append({
            "q_w": w(next(it), (HIDDEN, HIDDEN)), "q_b": jnp.zeros((HIDDEN,), jnp.float32),
            "k_w": w(next(it), (HIDDEN, HIDDEN)), "k_b": jnp.zeros((HIDDEN,), jnp.float32),
            "v_w": w(next(it), (HIDDEN, HIDDEN)), "v_b": jnp.zeros((HIDDEN,), jnp.float32),
            "o_w": w(next(it), (HIDDEN, HIDDEN)), "o_b": jnp.zeros((HIDDEN,), jnp.float32),
            "ln1_g": jnp.ones((HIDDEN,), jnp.float32), "ln1_b": jnp.zeros((HIDDEN,), jnp.float32),
            "i_w": w(next(it), (HIDDEN, INTERMEDIATE)), "i_b": jnp.zeros((INTERMEDIATE,), jnp.float32),
            "f_w": w(next(it), (INTERMEDIATE, HIDDEN)), "f_b": jnp.zeros((HIDDEN,), jnp.float32),
            "ln2_g": jnp.ones((HIDDEN,), jnp.float32), "ln2_b": jnp.zeros((HIDDEN,), jnp.float32),
        })
    for n_labels in NUM_LABELS_PER_COMPONENT:
        params["classifiers"].append(
            (w(next(it), (HIDDEN, n_labels)), jnp.zeros((n_labels,), jnp.float32)))
    return params


def pack_params(params):
    """One-time weight packing / layout prep (kept OUT of the per-call forward graph)."""
    layers = params["layers"]
    mm = jnp.bfloat16  # matmul-operand dtype; f32 accumulation inside the kernel

    def stack(fn):
        return jnp.stack([fn(ly) for ly in layers])

    qkv_w = stack(lambda ly: jnp.concatenate([ly["q_w"], ly["k_w"], ly["v_w"]],
                                             axis=1)).astype(mm)              # (L, H, 3H)
    qkv_b = stack(lambda ly: jnp.concatenate([ly["q_b"], ly["k_b"], ly["v_b"]],
                                             axis=0).reshape(1, 3 * HIDDEN))  # (L, 1, 3H)
    o_w = stack(lambda ly: ly["o_w"]).astype(mm)
    o_b = stack(lambda ly: ly["o_b"].reshape(1, HIDDEN))
    ln1_g = stack(lambda ly: ly["ln1_g"].reshape(1, HIDDEN))
    ln1_b = stack(lambda ly: ly["ln1_b"].reshape(1, HIDDEN))
    i_w = stack(lambda ly: ly["i_w"]).astype(mm)
    i_b = stack(lambda ly: ly["i_b"].reshape(1, INTERMEDIATE))
    f_w = stack(lambda ly: ly["f_w"]).astype(mm)
    f_b = stack(lambda ly: ly["f_b"].reshape(1, HIDDEN))
    ln2_g = stack(lambda ly: ly["ln2_g"].reshape(1, HIDDEN))
    ln2_b = stack(lambda ly: ly["ln2_b"].reshape(1, HIDDEN))

    # fuse + lane-pad the classifier heads: (H, 15) -> (H, 128)
    cls_w_cat = jnp.concatenate([w for (w, _) in params["classifiers"]], axis=1)
    cls_b_cat = jnp.concatenate([b for (_, b) in params["classifiers"]], axis=0)
    cls_w = (jnp.zeros((HIDDEN, CLS_PAD), jnp.float32)
             .at[:, :TOTAL_LABELS].set(cls_w_cat).astype(mm))
    cls_b = jnp.zeros((1, CLS_PAD), jnp.float32).at[:, :TOTAL_LABELS].set(cls_b_cat)

    return {
        "word_emb": params["word_emb"].astype(jnp.float32),   # kept f32: exact one-hot gather
        "pos_emb": params["pos_emb"].astype(jnp.float32),
        "tok_emb": params["tok_emb"].astype(jnp.float32),
        "emb_ln_g": params["emb_ln_g"].reshape(1, HIDDEN),
        "emb_ln_b": params["emb_ln_b"].reshape(1, HIDDEN),
        "qkv_w": qkv_w, "qkv_b": qkv_b, "o_w": o_w, "o_b": o_b,
        "ln1_g": ln1_g, "ln1_b": ln1_b, "i_w": i_w, "i_b": i_b,
        "f_w": f_w, "f_b": f_b, "ln2_g": ln2_g, "ln2_b": ln2_b,
        "cls_w": cls_w, "cls_b": cls_b,
    }


# ----------------------------- forward ----------------------------------
@jax.jit
def bert_address_parser_forward(packed, input_ids, attention_mask):
    B, S = input_ids.shape
    ids_col = input_ids.reshape(B * S, 1).astype(jnp.int32)   # (T, 1) for in-kernel one-hot
    mask = attention_mask.astype(jnp.int32)                   # (B, S)

    # ---- single fused pallas_call: embeddings + encoder + classifiers all in VMEM ----
    logits_padded = pl.pallas_call(
        functools.partial(_fused_bert_kernel, batch=B, seq=S),
        out_shape=jax.ShapeDtypeStruct((B, CLS_PAD), jnp.float32),
        in_specs=[_VMEM] * 21,
        out_specs=_VMEM,
    )(ids_col, mask,
      packed["word_emb"], packed["pos_emb"], packed["tok_emb"],
      packed["emb_ln_g"], packed["emb_ln_b"],
      packed["qkv_w"], packed["qkv_b"], packed["o_w"], packed["o_b"],
      packed["ln1_g"], packed["ln1_b"], packed["i_w"], packed["i_b"],
      packed["f_w"], packed["f_b"], packed["ln2_g"], packed["ln2_b"],
      packed["cls_w"], packed["cls_b"])

    # ---- slice fused logits back into the per-component list ----
    logits = []
    off = 0
    for n_labels in NUM_LABELS_PER_COMPONENT:
        logits.append(logits_padded[:, off:off + n_labels])
        off += n_labels
    return logits


# ------------------------------- main ------------------------------------
if __name__ == "__main__":
    key = jax.random.PRNGKey(0)
    pkey, ikey = jax.random.split(key)
    params = init_params(pkey)
    packed = pack_params(params)

    B, S = 2, 8
    input_ids = jax.random.randint(ikey, (B, S), 0, VOCAB, dtype=jnp.int32)
    attention_mask = jnp.array([[1] * S, [1] * (S - 3) + [0] * 3], dtype=jnp.int32)

    logits = bert_address_parser_forward(packed, input_ids, attention_mask)
    logits = [jax.block_until_ready(l) for l in logits]

    assert [tuple(l.shape) for l in logits] == [(B, n) for n in NUM_LABELS_PER_COMPONENT]
    assert all(bool(jnp.all(jnp.isfinite(l))) for l in logits)
    print("KERNEL_OK")
</pallas_src>

<mosaic_0001>
module attributes {stable_mosaic.version = 11 : i64} {
  func.func @_fused_bert_kernel(%arg0: memref<16x1xi32, #tpu.memory_space<vmem>>, %arg1: memref<2x8xi32, #tpu.memory_space<vmem>>, %arg2: memref<100x32xf32, #tpu.memory_space<vmem>>, %arg3: memref<16x32xf32, #tpu.memory_space<vmem>>, %arg4: memref<2x32xf32, #tpu.memory_space<vmem>>, %arg5: memref<1x32xf32, #tpu.memory_space<vmem>>, %arg6: memref<1x32xf32, #tpu.memory_space<vmem>>, %arg7: memref<2x32x96xbf16, #tpu.memory_space<vmem>>, %arg8: memref<2x1x96xf32, #tpu.memory_space<vmem>>, %arg9: memref<2x32x32xbf16, #tpu.memory_space<vmem>>, %arg10: memref<2x1x32xf32, #tpu.memory_space<vmem>>, %arg11: memref<2x1x32xf32, #tpu.memory_space<vmem>>, %arg12: memref<2x1x32xf32, #tpu.memory_space<vmem>>, %arg13: memref<2x32x64xbf16, #tpu.memory_space<vmem>>, %arg14: memref<2x1x64xf32, #tpu.memory_space<vmem>>, %arg15: memref<2x64x32xbf16, #tpu.memory_space<vmem>>, %arg16: memref<2x1x32xf32, #tpu.memory_space<vmem>>, %arg17: memref<2x1x32xf32, #tpu.memory_space<vmem>>, %arg18: memref<2x1x32xf32, #tpu.memory_space<vmem>>, %arg19: memref<32x128xbf16, #tpu.memory_space<vmem>>, %arg20: memref<1x128xf32, #tpu.memory_space<vmem>>, %arg21: memref<2x128xf32, #tpu.memory_space<vmem>>) attributes {dimension_semantics = [], scalar_prefetch = 0 : i64, scratch_operands = 0 : i64, tpu.core_type = #tpu.core_type<tc>} {
    %0 = tpu.iota {dimensions = array<i32: 1>} : vector<16x100xi32>
    %c0 = arith.constant 0 : index
    %c0_0 = arith.constant 0 : index
    %1 = vector.load %arg0[%c0, %c0_0] : memref<16x1xi32, #tpu.memory_space<vmem>>, vector<16x1xi32>
    %2 = vector.broadcast %1 : vector<16x1xi32> to vector<16x100xi32>
    %3 = arith.cmpi eq, %0, %2 : vector<16x100xi32>
    %4 = arith.extui %3 : vector<16x100xi1> to vector<16x100xi32>
    %5 = arith.sitofp %4 : vector<16x100xi32> to vector<16x100xf32>
    %c0_1 = arith.constant 0 : index
    %c0_2 = arith.constant 0 : index
    %6 = vector.load %arg2[%c0_1, %c0_2] : memref<100x32xf32, #tpu.memory_space<vmem>>, vector<100x32xf32>
    %cst = arith.constant dense<0.000000e+00> : vector<16x32xf32>
    %7 = tpu.matmul %5, %6, %cst {dimension_numbers = #tpu.dot_dimension_numbers<[1], [0], [0], [1], [0, 0, 1, 1], [], []>} : vector<16x100xf32>, vector<100x32xf32>, vector<16x32xf32> -> vector<16x32xf32>
    %c0_3 = arith.constant 0 : index
    %c0_4 = arith.constant 0 : index
    %8 = vector.load %arg3[%c0_3, %c0_4] : memref<16x32xf32, #tpu.memory_space<vmem>>, vector<8x32xf32>
    %9 = tpu.concatenate %8, %8 in 0 : vector<8x32xf32>, vector<8x32xf32> -> vector<16x32xf32>
    %10 = arith.addf %7, %9 : vector<16x32xf32>
    %c0_5 = arith.constant 0 : index
    %c0_6 = arith.constant 0 : index
    %11 = vector.load %arg4[%c0_5, %c0_6] : memref<2x32xf32, #tpu.memory_space<vmem>>, vector<1x32xf32>
    %12 = vector.broadcast %11 : vector<1x32xf32> to vector<16x32xf32>
    %13 = arith.addf %10, %12 : vector<16x32xf32>
    %c0_7 = arith.constant 0 : index
    %c0_8 = arith.constant 0 : index
    %14 = vector.load %arg5[%c0_7, %c0_8] : memref<1x32xf32, #tpu.memory_space<vmem>>, vector<1x32xf32>
    %c0_9 = arith.constant 0 : index
    %c0_10 = arith.constant 0 : index
    %15 = vector.load %arg6[%c0_9, %c0_10] : memref<1x32xf32, #tpu.memory_space<vmem>>, vector<1x32xf32>
    %cst_11 = arith.constant dense<0.000000e+00> : vector<16xf32>
    %16 = vector.multi_reduction <add>, %13, %cst_11 [1] : vector<16x32xf32> to vector<16xf32>
    %17 = vector.shape_cast %16 : vector<16xf32> to vector<16x1xf32>
    %cst_12 = arith.constant 3.200000e+01 : f32
    %18 = vector.broadcast %cst_12 : f32 to vector<16x1xf32>
    %19 = arith.divf %17, %18 : vector<16x1xf32>
    %20 = vector.broadcast %19 : vector<16x1xf32> to vector<16x32xf32>
    %21 = arith.subf %13, %20 : vector<16x32xf32>
    %22 = arith.mulf %21, %21 : vector<16x32xf32>
    %cst_13 = arith.constant dense<0.000000e+00> : vector<16xf32>
    %23 = vector.multi_reduction <add>, %22, %cst_13 [1] : vector<16x32xf32> to vector<16xf32>
    %24 = vector.shape_cast %23 : vector<16xf32> to vector<16x1xf32>
    %cst_14 = arith.constant 3.200000e+01 : f32
    %25 = vector.broadcast %cst_14 : f32 to vector<16x1xf32>
    %26 = arith.divf %24, %25 : vector<16x1xf32>
    %27 = vector.broadcast %19 : vector<16x1xf32> to vector<16x32xf32>
    %28 = arith.subf %13, %27 : vector<16x32xf32>
    %cst_15 = arith.constant 9.99999996E-13 : f32
    %29 = vector.broadcast %cst_15 : f32 to vector<16x1xf32>
    %30 = arith.addf %26, %29 : vector<16x1xf32>
    %31 = math.rsqrt %30 : vector<16x1xf32>
    %32 = vector.broadcast %31 : vector<16x1xf32> to vector<16x32xf32>
    %33 = arith.mulf %28, %32 : vector<16x32xf32>
    %34 = vector.broadcast %14 : vector<1x32xf32> to vector<16x32xf32>
    %35 = arith.mulf %33, %34 : vector<16x32xf32>
    %36 = vector.broadcast %15 : vector<1x32xf32> to vector<16x32xf32>
    %37 = arith.addf %35, %36 : vector<16x32xf32>
    %c0_16 = arith.constant 0 : index
    %c0_17 = arith.constant 0 : index
    %38 = vector.load %arg1[%c0_16, %c0_17] : memref<2x8xi32, #tpu.memory_space<vmem>>, vector<2x8xi32>
    %39 = arith.sitofp %38 : vector<2x8xi32> to vector<2x8xf32>
    %cst_18 = arith.constant 1.000000e+00 : f32
    %40 = vector.broadcast %cst_18 : f32 to vector<2x8xf32>
    %41 = arith.subf %40, %39 : vector<2x8xf32>
    %cst_19 = arith.constant -1.000000e+09 : f32
    %42 = vector.broadcast %cst_19 : f32 to vector<2x8xf32>
    %43 = arith.mulf %41, %42 : vector<2x8xf32>
    %44 = vector.extract_strided_slice %43 {offsets = [0, 0], sizes = [1, 8], strides = [1, 1]} : vector<2x8xf32> to vector<1x8xf32>
    %45 = vector.shape_cast %44 : vector<1x8xf32> to vector<1x8xf32>
    %46 = vector.broadcast %45 : vector<1x8xf32> to vector<32x8xf32>
    %47 = vector.extract_strided_slice %43 {offsets = [1, 0], sizes = [1, 8], strides = [1, 1]} : vector<2x8xf32> to vector<1x8xf32>
    %48 = vector.shape_cast %47 : vector<1x8xf32> to vector<1x8xf32>
    %49 = vector.broadcast %48 : vector<1x8xf32> to vector<32x8xf32>
    %50 = tpu.concatenate %46, %49 in 0 : vector<32x8xf32>, vector<32x8xf32> -> vector<64x8xf32>
    %51 = arith.truncf %37 : vector<16x32xf32> to vector<16x32xbf16>
    %c0_20 = arith.constant 0 : index
    %c0_21 = arith.constant 0 : index
    %c0_22 = arith.constant 0 : index
    %52 = vector.load %arg7[%c0_20, %c0_21, %c0_22] : memref<2x32x96xbf16, #tpu.memory_space<vmem>>, vector<1x32x96xbf16>
    %53 = vector.shape_cast %52 : vector<1x32x96xbf16> to vector<32x96xbf16>
    %cst_23 = arith.constant dense<0.000000e+00> : vector<16x96xf32>
    %54 = tpu.matmul %51, %53, %cst_23 {dimension_numbers = #tpu.dot_dimension_numbers<[1], [0], [0], [1], [0, 0, 1, 1], [], []>} : vector<16x32xbf16>, vector<32x96xbf16>, vector<16x96xf32> -> vector<16x96xf32>
    %c0_24 = arith.constant 0 : index
    %c0_25 = arith.constant 0 : index
    %c0_26 = arith.constant 0 : index
    %55 = vector.load %arg8[%c0_24, %c0_25, %c0_26] : memref<2x1x96xf32, #tpu.memory_space<vmem>>, vector<1x1x96xf32>
    %56 = vector.shape_cast %55 : vector<1x1x96xf32> to vector<1x96xf32>
    %57 = vector.broadcast %56 : vector<1x96xf32> to vector<16x96xf32>
    %58 = arith.addf %54, %57 : vector<16x96xf32>
    %59 = arith.truncf %58 : vector<16x96xf32> to vector<16x96xbf16>
    %60 = vector.extract_strided_slice %59 {offsets = [0, 0], sizes = [8, 8], strides = [1, 1]} : vector<16x96xbf16> to vector<8x8xbf16>
    %61 = vector.extract_strided_slice %59 {offsets = [0, 32], sizes = [8, 8], strides = [1, 1]} : vector<16x96xbf16> to vector<8x8xbf16>
    %cst_27 = arith.constant dense<0.000000e+00> : vector<8x8xf32>
    %62 = tpu.matmul %60, %61, %cst_27 {dimension_numbers = #tpu.dot_dimension_numbers<[1], [1], [0], [0], [0, 0, 1, 0], [], []>} : vector<8x8xbf16>, vector<8x8xbf16>, vector<8x8xf32> -> vector<8x8xf32>
    %63 = vector.extract_strided_slice %59 {offsets = [0, 8], sizes = [8, 8], strides = [1, 1]} : vector<16x96xbf16> to vector<8x8xbf16>
    %64 = vector.extract_strided_slice %59 {offsets = [0, 40], sizes = [8, 8], strides = [1, 1]} : vector<16x96xbf16> to vector<8x8xbf16>
    %cst_28 = arith.constant dense<0.000000e+00> : vector<8x8xf32>
    %65 = tpu.matmul %63, %64, %cst_28 {dimension_numbers = #tpu.dot_dimension_numbers<[1], [1], [0], [0], [0, 0, 1, 0], [], []>} : vector<8x8xbf16>, vector<8x8xbf16>, vector<8x8xf32> -> vector<8x8xf32>
    %66 = vector.extract_strided_slice %59 {offsets = [0, 16], sizes = [8, 8], strides = [1, 1]} : vector<16x96xbf16> to vector<8x8xbf16>
    %67 = vector.extract_strided_slice %59 {offsets = [0, 48], sizes = [8, 8], strides = [1, 1]} : vector<16x96xbf16> to vector<8x8xbf16>
    %cst_29 = arith.constant dense<0.000000e+00> : vector<8x8xf32>
    %68 = tpu.matmul %66, %67, %cst_29 {dimension_numbers = #tpu.dot_dimension_numbers<[1], [1], [0], [0], [0, 0, 1, 0], [], []>} : vector<8x8xbf16>, vector<8x8xbf16>, vector<8x8xf32> -> vector<8x8xf32>
    %69 = vector.extract_strided_slice %59 {offsets = [0, 24], sizes = [8, 8], strides = [1, 1]} : vector<16x96xbf16> to vector<8x8xbf16>
    %70 = vector.extract_strided_slice %59 {offsets = [0, 56], sizes = [8, 8], strides = [1, 1]} : vector<16x96xbf16> to vector<8x8xbf16>
    %cst_30 = arith.constant dense<0.000000e+00> : vector<8x8xf32>
    %71 = tpu.matmul %69, %70, %cst_30 {dimension_numbers = #tpu.dot_dimension_numbers<[1], [1], [0], [0], [0, 0, 1, 0], [], []>} : vector<8x8xbf16>, vector<8x8xbf16>, vector<8x8xf32> -> vector<8x8xf32>
    %72 = vector.extract_strided_slice %59 {offsets = [8, 0], sizes = [8, 8], strides = [1, 1]} : vector<16x96xbf16> to vector<8x8xbf16>
    %73 = vector.extract_strided_slice %59 {offsets = [8, 32], sizes = [8, 8], strides = [1, 1]} : vector<16x96xbf16> to vector<8x8xbf16>
    %cst_31 = arith.constant dense<0.000000e+00> : vector<8x8xf32>
    %74 = tpu.matmul %72, %73, %cst_31 {dimension_numbers = #tpu.dot_dimension_numbers<[1], [1], [0], [0], [0, 0, 1, 0], [], []>} : vector<8x8xbf16>, vector<8x8xbf16>, vector<8x8xf32> -> vector<8x8xf32>
    %75 = vector.extract_strided_slice %59 {offsets = [8, 8], sizes = [8, 8], strides = [1, 1]} : vector<16x96xbf16> to vector<8x8xbf16>
    %76 = vector.extract_strided_slice %59 {offsets = [8, 40], sizes = [8, 8], strides = [1, 1]} : vector<16x96xbf16> to vector<8x8xbf16>
    %cst_32 = arith.constant dense<0.000000e+00> : vector<8x8xf32>
    %77 = tpu.matmul %75, %76, %cst_32 {dimension_numbers = #tpu.dot_dimension_numbers<[1], [1], [0], [0], [0, 0, 1, 0], [], []>} : vector<8x8xbf16>, vector<8x8xbf16>, vector<8x8xf32> -> vector<8x8xf32>
    %78 = vector.extract_strided_slice %59 {offsets = [8, 16], sizes = [8, 8], strides = [1, 1]} : vector<16x96xbf16> to vector<8x8xbf16>
    %79 = vector.extract_strided_slice %59 {offsets = [8, 48], sizes = [8, 8], strides = [1, 1]} : vector<16x96xbf16> to vector<8x8xbf16>
    %cst_33 = arith.constant dense<0.000000e+00> : vector<8x8xf32>
    %80 = tpu.matmul %78, %79, %cst_33 {dimension_numbers = #tpu.dot_dimension_numbers<[1], [1], [0], [0], [0, 0, 1, 0], [], []>} : vector<8x8xbf16>, vector<8x8xbf16>, vector<8x8xf32> -> vector<8x8xf32>
    %81 = vector.extract_strided_slice %59 {offsets = [8, 24], sizes = [8, 8], strides = [1, 1]} : vector<16x96xbf16> to vector<8x8xbf16>
    %82 = vector.extract_strided_slice %59 {offsets = [8, 56], sizes = [8, 8], strides = [1, 1]} : vector<16x96xbf16> to vector<8x8xbf16>
    %cst_34 = arith.constant dense<0.000000e+00> : vector<8x8xf32>
    %83 = tpu.matmul %81, %82, %cst_34 {dimension_numbers = #tpu.dot_dimension_numbers<[1], [1], [0], [0], [0, 0, 1, 0], [], []>} : vector<8x8xbf16>, vector<8x8xbf16>, vector<8x8xf32> -> vector<8x8xf32>
    %84 = tpu.concatenate %62, %65, %68, %71, %74, %77, %80, %83 in 0 : vector<8x8xf32>, vector<8x8xf32>, vector<8x8xf32>, vector<8x8xf32>, vector<8x8xf32>, vector<8x8xf32>, vector<8x8xf32>, vector<8x8xf32> -> vector<64x8xf32>
    %cst_35 = arith.constant 0.353553385 : f32
    %85 = vector.broadcast %cst_35 : f32 to vector<64x8xf32>
    %86 = arith.mulf %84, %85 : vector<64x8xf32>
    %87 = arith.addf %86, %50 : vector<64x8xf32>
    %cst_36 = arith.constant dense<0xFF800000> : vector<64xf32>
    %88 = vector.multi_reduction <maximumf>, %87, %cst_36 [1] : vector<64x8xf32> to vector<64xf32>
    %89 = vector.shape_cast %88 : vector<64xf32> to vector<64x1xf32>
    %90 = vector.broadcast %89 : vector<64x1xf32> to vector<64x8xf32>
    %91 = arith.subf %87, %90 : vector<64x8xf32>
    %92 = math.exp %91 : vector<64x8xf32>
    %cst_37 = arith.constant dense<0.000000e+00> : vector<64xf32>
    %93 = vector.multi_reduction <add>, %92, %cst_37 [1] : vector<64x8xf32> to vector<64xf32>
    %94 = vector.shape_cast %93 : vector<64xf32> to vector<64x1xf32>
    %95 = tpu.reciprocal %94 {approx = true} : vector<64x1xf32> -> vector<64x1xf32>
    %96 = vector.broadcast %95 : vector<64x1xf32> to vector<64x8xf32>
    %97 = arith.mulf %92, %96 : vector<64x8xf32>
    %98 = arith.truncf %97 : vector<64x8xf32> to vector<64x8xbf16>
    %99 = vector.extract_strided_slice %98 {offsets = [0, 0], sizes = [8, 8], strides = [1, 1]} : vector<64x8xbf16> to vector<8x8xbf16>
    %100 = vector.extract_strided_slice %59 {offsets = [0, 64], sizes = [8, 8], strides = [1, 1]} : vector<16x96xbf16> to vector<8x8xbf16>
    %cst_38 = arith.constant dense<0.000000e+00> : vector<8x8xf32>
    %101 = tpu.matmul %99, %100, %cst_38 {dimension_numbers = #tpu.dot_dimension_numbers<[1], [0], [0], [1], [0, 0, 1, 1], [], []>} : vector<8x8xbf16>, vector<8x8xbf16>, vector<8x8xf32> -> vector<8x8xf32>
    %102 = vector.extract_strided_slice %98 {offsets = [8, 0], sizes = [8, 8], strides = [1, 1]} : vector<64x8xbf16> to vector<8x8xbf16>
    %103 = vector.extract_strided_slice %59 {offsets = [0, 72], sizes = [8, 8], strides = [1, 1]} : vector<16x96xbf16> to vector<8x8xbf16>
    %cst_39 = arith.constant dense<0.000000e+00> : vector<8x8xf32>
    %104 = tpu.matmul %102, %103, %cst_39 {dimension_numbers = #tpu.dot_dimension_numbers<[1], [0], [0], [1], [0, 0, 1, 1], [], []>} : vector<8x8xbf16>, vector<8x8xbf16>, vector<8x8xf32> -> vector<8x8xf32>
    %105 = vector.extract_strided_slice %98 {offsets = [16, 0], sizes = [8, 8], strides = [1, 1]} : vector<64x8xbf16> to vector<8x8xbf16>
    %106 = vector.extract_strided_slice %59 {offsets = [0, 80], sizes = [8, 8], strides = [1, 1]} : vector<16x96xbf16> to vector<8x8xbf16>
    %cst_40 = arith.constant dense<0.000000e+00> : vector<8x8xf32>
    %107 = tpu.matmul %105, %106, %cst_40 {dimension_numbers = #tpu.dot_dimension_numbers<[1], [0], [0], [1], [0, 0, 1, 1], [], []>} : vector<8x8xbf16>, vector<8x8xbf16>, vector<8x8xf32> -> vector<8x8xf32>
    %108 = vector.extract_strided_slice %98 {offsets = [24, 0], sizes = [8, 8], strides = [1, 1]} : vector<64x8xbf16> to vector<8x8xbf16>
    %109 = vector.extract_strided_slice %59 {offsets = [0, 88], sizes = [8, 8], strides = [1, 1]} : vector<16x96xbf16> to vector<8x8xbf16>
    %cst_41 = arith.constant dense<0.000000e+00> : vector<8x8xf32>
    %110 = tpu.matmul %108, %109, %cst_41 {dimension_numbers = #tpu.dot_dimension_numbers<[1], [0], [0], [1], [0, 0, 1, 1], [], []>} : vector<8x8xbf16>, vector<8x8xbf16>, vector<8x8xf32> -> vector<8x8xf32>
    %111 = tpu.concatenate %101, %104, %107, %110 in 1 : vector<8x8xf32>, vector<8x8xf32>, vector<8x8xf32>, vector<8x8xf32> -> vector<8x32xf32>
    %112 = vector.extract_strided_slice %98 {offsets = [32, 0], sizes = [8, 8], strides = [1, 1]} : vector<64x8xbf16> to vector<8x8xbf16>
    %113 = vector.extract_strided_slice %59 {offsets = [8, 64], sizes = [8, 8], strides = [1, 1]} : vector<16x96xbf16> to vector<8x8xbf16>
    %cst_42 = arith.constant dense<0.000000e+00> : vector<8x8xf32>
    %114 = tpu.matmul %112, %113, %cst_42 {dimension_numbers = #tpu.dot_dimension_numbers<[1], [0], [0], [1], [0, 0, 1, 1], [], []>} : vector<8x8xbf16>, vector<8x8xbf16>, vector<8x8xf32> -> vector<8x8xf32>
    %115 = vector.extract_strided_slice %98 {offsets = [40, 0], sizes = [8, 8], strides = [1, 1]} : vector<64x8xbf16> to vector<8x8xbf16>
    %116 = vector.extract_strided_slice %59 {offsets = [8, 72], sizes = [8, 8], strides = [1, 1]} : vector<16x96xbf16> to vector<8x8xbf16>
    %cst_43 = arith.constant dense<0.000000e+00> : vector<8x8xf32>
    %117 = tpu.matmul %115, %116, %cst_43 {dimension_numbers = #tpu.dot_dimension_numbers<[1], [0], [0], [1], [0, 0, 1, 1], [], []>} : vector<8x8xbf16>, vector<8x8xbf16>, vector<8x8xf32> -> vector<8x8xf32>
    %118 = vector.extract_strided_slice %98 {offsets = [48, 0], sizes = [8, 8], strides = [1, 1]} : vector<64x8xbf16> to vector<8x8xbf16>
    %119 = vector.extract_strided_slice %59 {offsets = [8, 80], sizes = [8, 8], strides = [1, 1]} : vector<16x96xbf16> to vector<8x8xbf16>
    %cst_44 = arith.constant dense<0.000000e+00> : vector<8x8xf32>
    %120 = tpu.matmul %118, %119, %cst_44 {dimension_numbers = #tpu.dot_dimension_numbers<[1], [0], [0], [1], [0, 0, 1, 1], [], []>} : vector<8x8xbf16>, vector<8x8xbf16>, vector<8x8xf32> -> vector<8x8xf32>
    %121 = vector.extract_strided_slice %98 {offsets = [56, 0], sizes = [8, 8], strides = [1, 1]} : vector<64x8xbf16> to vector<8x8xbf16>
    %122 = vector.extract_strided_slice %59 {offsets = [8, 88], sizes = [8, 8], strides = [1, 1]} : vector<16x96xbf16> to vector<8x8xbf16>
    %cst_45 = arith.constant dense<0.000000e+00> : vector<8x8xf32>
    %123 = tpu.matmul %121, %122, %cst_45 {dimension_numbers = #tpu.dot_dimension_numbers<[1], [0], [0], [1], [0, 0, 1, 1], [], []>} : vector<8x8xbf16>, vector<8x8xbf16>, vector<8x8xf32> -> vector<8x8xf32>
    %124 = tpu.concatenate %114, %117, %120, %123 in 1 : vector<8x8xf32>, vector<8x8xf32>, vector<8x8xf32>, vector<8x8xf32> -> vector<8x32xf32>
    %125 = tpu.concatenate %111, %124 in 0 : vector<8x32xf32>, vector<8x32xf32> -> vector<16x32xf32>
    %126 = arith.truncf %125 : vector<16x32xf32> to vector<16x32xbf16>
    %c0_46 = arith.constant 0 : index
    %c0_47 = arith.constant 0 : index
    %c0_48 = arith.constant 0 : index
    %127 = vector.load %arg9[%c0_46, %c0_47, %c0_48] : memref<2x32x32xbf16, #tpu.memory_space<vmem>>, vector<1x32x32xbf16>
    %128 = vector.shape_cast %127 : vector<1x32x32xbf16> to vector<32x32xbf16>
    %cst_49 = arith.constant dense<0.000000e+00> : vector<16x32xf32>
    %129 = tpu.matmul %126, %128, %cst_49 {dimension_numbers = #tpu.dot_dimension_numbers<[1], [0], [0], [1], [0, 0, 1, 1], [], []>} : vector<16x32xbf16>, vector<32x32xbf16>, vector<16x32xf32> -> vector<16x32xf32>
    %c0_50 = arith.constant 0 : index
    %c0_51 = arith.constant 0 : index
    %c0_52 = arith.constant 0 : index
    %130 = vector.load %arg10[%c0_50, %c0_51, %c0_52] : memref<2x1x32xf32, #tpu.memory_space<vmem>>, vector<1x1x32xf32>
    %131 = vector.shape_cast %130 : vector<1x1x32xf32> to vector<1x32xf32>
    %132 = vector.broadcast %131 : vector<1x32xf32> to vector<16x32xf32>
    %133 = arith.addf %129, %132 : vector<16x32xf32>
    %134 = arith.addf %133, %37 : vector<16x32xf32>
    %c0_53 = arith.constant 0 : index
    %c0_54 = arith.constant 0 : index
    %c0_55 = arith.constant 0 : index
    %135 = vector.load %arg11[%c0_53, %c0_54, %c0_55] : memref<2x1x32xf32, #tpu.memory_space<vmem>>, vector<1x1x32xf32>
    %136 = vector.shape_cast %135 : vector<1x1x32xf32> to vector<1x32xf32>
    %c0_56 = arith.constant 0 : index
    %c0_57 = arith.constant 0 : index
    %c0_58 = arith.constant 0 : index
    %137 = vector.load %arg12[%c0_56, %c0_57, %c0_58] : memref<2x1x32xf32, #tpu.memory_space<vmem>>, vector<1x1x32xf32>
    %138 = vector.shape_cast %137 : vector<1x1x32xf32> to vector<1x32xf32>
    %cst_59 = arith.constant dense<0.000000e+00> : vector<16xf32>
    %139 = vector.multi_reduction <add>, %134, %cst_59 [1] : vector<16x32xf32> to vector<16xf32>
    %140 = vector.shape_cast %139 : vector<16xf32> to vector<16x1xf32>
    %cst_60 = arith.constant 3.200000e+01 : f32
    %141 = vector.broadcast %cst_60 : f32 to vector<16x1xf32>
    %142 = arith.divf %140, %141 : vector<16x1xf32>
    %143 = vector.broadcast %142 : vector<16x1xf32> to vector<16x32xf32>
    %144 = arith.subf %134, %143 : vector<16x32xf32>
    %145 = arith.mulf %144, %144 : vector<16x32xf32>
    %cst_61 = arith.constant dense<0.000000e+00> : vector<16xf32>
    %146 = vector.multi_reduction <add>, %145, %cst_61 [1] : vector<16x32xf32> to vector<16xf32>
    %147 = vector.shape_cast %146 : vector<16xf32> to vector<16x1xf32>
    %cst_62 = arith.constant 3.200000e+01 : f32
    %148 = vector.broadcast %cst_62 : f32 to vector<16x1xf32>
    %149 = arith.divf %147, %148 : vector<16x1xf32>
    %150 = vector.broadcast %142 : vector<16x1xf32> to vector<16x32xf32>
    %151 = arith.subf %134, %150 : vector<16x32xf32>
    %cst_63 = arith.constant 9.99999996E-13 : f32
    %152 = vector.broadcast %cst_63 : f32 to vector<16x1xf32>
    %153 = arith.addf %149, %152 : vector<16x1xf32>
    %154 = math.rsqrt %153 : vector<16x1xf32>
    %155 = vector.broadcast %154 : vector<16x1xf32> to vector<16x32xf32>
    %156 = arith.mulf %151, %155 : vector<16x32xf32>
    %157 = vector.broadcast %136 : vector<1x32xf32> to vector<16x32xf32>
    %158 = arith.mulf %156, %157 : vector<16x32xf32>
    %159 = vector.broadcast %138 : vector<1x32xf32> to vector<16x32xf32>
    %160 = arith.addf %158, %159 : vector<16x32xf32>
    %161 = arith.truncf %160 : vector<16x32xf32> to vector<16x32xbf16>
    %c0_64 = arith.constant 0 : index
    %c0_65 = arith.constant 0 : index
    %c0_66 = arith.constant 0 : index
    %162 = vector.load %arg13[%c0_64, %c0_65, %c0_66] : memref<2x32x64xbf16, #tpu.memory_space<vmem>>, vector<1x32x64xbf16>
    %163 = vector.shape_cast %162 : vector<1x32x64xbf16> to vector<32x64xbf16>
    %cst_67 = arith.constant dense<0.000000e+00> : vector<16x64xf32>
    %164 = tpu.matmul %161, %163, %cst_67 {dimension_numbers = #tpu.dot_dimension_numbers<[1], [0], [0], [1], [0, 0, 1, 1], [], []>} : vector<16x32xbf16>, vector<32x64xbf16>, vector<16x64xf32> -> vector<16x64xf32>
    %c0_68 = arith.constant 0 : index
    %c0_69 = arith.constant 0 : index
    %c0_70 = arith.constant 0 : index
    %165 = vector.load %arg14[%c0_68, %c0_69, %c0_70] : memref<2x1x64xf32, #tpu.memory_space<vmem>>, vector<1x1x64xf32>
    %166 = vector.shape_cast %165 : vector<1x1x64xf32> to vector<1x64xf32>
    %167 = vector.broadcast %166 : vector<1x64xf32> to vector<16x64xf32>
    %168 = arith.addf %164, %167 : vector<16x64xf32>
    %cst_71 = arith.constant 5.000000e-01 : f32
    %169 = vector.broadcast %cst_71 : f32 to vector<16x64xf32>
    %170 = arith.mulf %169, %168 : vector<16x64xf32>
    %cst_72 = arith.constant 4.471500e-02 : f32
    %171 = vector.broadcast %cst_72 : f32 to vector<16x64xf32>
    %172 = arith.mulf %171, %168 : vector<16x64xf32>
    %173 = arith.mulf %172, %168 : vector<16x64xf32>
    %174 = arith.mulf %173, %168 : vector<16x64xf32>
    %175 = arith.addf %168, %174 : vector<16x64xf32>
    %cst_73 = arith.constant 0.797884583 : f32
    %176 = vector.broadcast %cst_73 : f32 to vector<16x64xf32>
    %177 = arith.mulf %176, %175 : vector<16x64xf32>
    %178 = math.tanh %177 : vector<16x64xf32>
    %cst_74 = arith.constant 1.000000e+00 : f32
    %179 = vector.broadcast %cst_74 : f32 to vector<16x64xf32>
    %180 = arith.addf %179, %178 : vector<16x64xf32>
    %181 = arith.mulf %170, %180 : vector<16x64xf32>
    %182 = arith.truncf %181 : vector<16x64xf32> to vector<16x64xbf16>
    %c0_75 = arith.constant 0 : index
    %c0_76 = arith.constant 0 : index
    %c0_77 = arith.constant 0 : index
    %183 = vector.load %arg15[%c0_75, %c0_76, %c0_77] : memref<2x64x32xbf16, #tpu.memory_space<vmem>>, vector<1x64x32xbf16>
    %184 = vector.shape_cast %183 : vector<1x64x32xbf16> to vector<64x32xbf16>
    %cst_78 = arith.constant dense<0.000000e+00> : vector<16x32xf32>
    %185 = tpu.matmul %182, %184, %cst_78 {dimension_numbers = #tpu.dot_dimension_numbers<[1], [0], [0], [1], [0, 0, 1, 1], [], []>} : vector<16x64xbf16>, vector<64x32xbf16>, vector<16x32xf32> -> vector<16x32xf32>
    %c0_79 = arith.constant 0 : index
    %c0_80 = arith.constant 0 : index
    %c0_81 = arith.constant 0 : index
    %186 = vector.load %arg16[%c0_79, %c0_80, %c0_81] : memref<2x1x32xf32, #tpu.memory_space<vmem>>, vector<1x1x32xf32>
    %187 = vector.shape_cast %186 : vector<1x1x32xf32> to vector<1x32xf32>
    %188 = vector.broadcast %187 : vector<1x32xf32> to vector<16x32xf32>
    %189 = arith.addf %185, %188 : vector<16x32xf32>
    %190 = arith.addf %189, %160 : vector<16x32xf32>
    %c0_82 = arith.constant 0 : index
    %c0_83 = arith.constant 0 : index
    %c0_84 = arith.constant 0 : index
    %191 = vector.load %arg17[%c0_82, %c0_83, %c0_84] : memref<2x1x32xf32, #tpu.memory_space<vmem>>, vector<1x1x32xf32>
    %192 = vector.shape_cast %191 : vector<1x1x32xf32> to vector<1x32xf32>
    %c0_85 = arith.constant 0 : index
    %c0_86 = arith.constant 0 : index
    %c0_87 = arith.constant 0 : index
    %193 = vector.load %arg18[%c0_85, %c0_86, %c0_87] : memref<2x1x32xf32, #tpu.memory_space<vmem>>, vector<1x1x32xf32>
    %194 = vector.shape_cast %193 : vector<1x1x32xf32> to vector<1x32xf32>
    %cst_88 = arith.constant dense<0.000000e+00> : vector<16xf32>
    %195 = vector.multi_reduction <add>, %190, %cst_88 [1] : vector<16x32xf32> to vector<16xf32>
    %196 = vector.shape_cast %195 : vector<16xf32> to vector<16x1xf32>
    %cst_89 = arith.constant 3.200000e+01 : f32
    %197 = vector.broadcast %cst_89 : f32 to vector<16x1xf32>
    %198 = arith.divf %196, %197 : vector<16x1xf32>
    %199 = vector.broadcast %198 : vector<16x1xf32> to vector<16x32xf32>
    %200 = arith.subf %190, %199 : vector<16x32xf32>
    %201 = arith.mulf %200, %200 : vector<16x32xf32>
    %cst_90 = arith.constant dense<0.000000e+00> : vector<16xf32>
    %202 = vector.multi_reduction <add>, %201, %cst_90 [1] : vector<16x32xf32> to vector<16xf32>
    %203 = vector.shape_cast %202 : vector<16xf32> to vector<16x1xf32>
    %cst_91 = arith.constant 3.200000e+01 : f32
    %204 = vector.broadcast %cst_91 : f32 to vector<16x1xf32>
    %205 = arith.divf %203, %204 : vector<16x1xf32>
    %206 = vector.broadcast %198 : vector<16x1xf32> to vector<16x32xf32>
    %207 = arith.subf %190, %206 : vector<16x32xf32>
    %cst_92 = arith.constant 9.99999996E-13 : f32
    %208 = vector.broadcast %cst_92 : f32 to vector<16x1xf32>
    %209 = arith.addf %205, %208 : vector<16x1xf32>
    %210 = math.rsqrt %209 : vector<16x1xf32>
    %211 = vector.broadcast %210 : vector<16x1xf32> to vector<16x32xf32>
    %212 = arith.mulf %207, %211 : vector<16x32xf32>
    %213 = vector.broadcast %192 : vector<1x32xf32> to vector<16x32xf32>
    %214 = arith.mulf %212, %213 : vector<16x32xf32>
    %215 = vector.broadcast %194 : vector<1x32xf32> to vector<16x32xf32>
    %216 = arith.addf %214, %215 : vector<16x32xf32>
    %217 = arith.truncf %216 : vector<16x32xf32> to vector<16x32xbf16>
    %c1 = arith.constant 1 : index
    %c0_93 = arith.constant 0 : index
    %c0_94 = arith.constant 0 : index
    %218 = vector.load %arg7[%c1, %c0_93, %c0_94] : memref<2x32x96xbf16, #tpu.memory_space<vmem>>, vector<1x32x96xbf16>
    %219 = vector.shape_cast %218 : vector<1x32x96xbf16> to vector<32x96xbf16>
    %cst_95 = arith.constant dense<0.000000e+00> : vector<16x96xf32>
    %220 = tpu.matmul %217, %219, %cst_95 {dimension_numbers = #tpu.dot_dimension_numbers<[1], [0], [0], [1], [0, 0, 1, 1], [], []>} : vector<16x32xbf16>, vector<32x96xbf16>, vector<16x96xf32> -> vector<16x96xf32>
    %c1_96 = arith.constant 1 : index
    %c0_97 = arith.constant 0 : index
    %c0_98 = arith.constant 0 : index
    %221 = vector.load %arg8[%c1_96, %c0_97, %c0_98] : memref<2x1x96xf32, #tpu.memory_space<vmem>>, vector<1x1x96xf32>
    %222 = vector.shape_cast %221 : vector<1x1x96xf32> to vector<1x96xf32>
    %223 = vector.broadcast %222 : vector<1x96xf32> to vector<16x96xf32>
    %224 = arith.addf %220, %223 : vector<16x96xf32>
    %225 = arith.truncf %224 : vector<16x96xf32> to vector<16x96xbf16>
    %226 = vector.extract_strided_slice %225 {offsets = [0, 0], sizes = [8, 8], strides = [1, 1]} : vector<16x96xbf16> to vector<8x8xbf16>
    %227 = vector.extract_strided_slice %225 {offsets = [0, 32], sizes = [8, 8], strides = [1, 1]} : vector<16x96xbf16> to vector<8x8xbf16>
    %cst_99 = arith.constant dense<0.000000e+00> : vector<8x8xf32>
    %228 = tpu.matmul %226, %227, %cst_99 {dimension_numbers = #tpu.dot_dimension_numbers<[1], [1], [0], [0], [0, 0, 1, 0], [], []>} : vector<8x8xbf16>, vector<8x8xbf16>, vector<8x8xf32> -> vector<8x8xf32>
    %229 = vector.extract_strided_slice %225 {offsets = [0, 8], sizes = [8, 8], strides = [1, 1]} : vector<16x96xbf16> to vector<8x8xbf16>
    %230 = vector.extract_strided_slice %225 {offsets = [0, 40], sizes = [8, 8], strides = [1, 1]} : vector<16x96xbf16> to vector<8x8xbf16>
    %cst_100 = arith.constant dense<0.000000e+00> : vector<8x8xf32>
    %231 = tpu.matmul %229, %230, %cst_100 {dimension_numbers = #tpu.dot_dimension_numbers<[1], [1], [0], [0], [0, 0, 1, 0], [], []>} : vector<8x8xbf16>, vector<8x8xbf16>, vector<8x8xf32> -> vector<8x8xf32>
    %232 = vector.extract_strided_slice %225 {offsets = [0, 16], sizes = [8, 8], strides = [1, 1]} : vector<16x96xbf16> to vector<8x8xbf16>
    %233 = vector.extract_strided_slice %225 {offsets = [0, 48], sizes = [8, 8], strides = [1, 1]} : vector<16x96xbf16> to vector<8x8xbf16>
    %cst_101 = arith.constant dense<0.000000e+00> : vector<8x8xf32>
    %234 = tpu.matmul %232, %233, %cst_101 {dimension_numbers = #tpu.dot_dimension_numbers<[1], [1], [0], [0], [0, 0, 1, 0], [], []>} : vector<8x8xbf16>, vector<8x8xbf16>, vector<8x8xf32> -> vector<8x8xf32>
    %235 = vector.extract_strided_slice %225 {offsets = [0, 24], sizes = [8, 8], strides = [1, 1]} : vector<16x96xbf16> to vector<8x8xbf16>
    %236 = vector.extract_strided_slice %225 {offsets = [0, 56], sizes = [8, 8], strides = [1, 1]} : vector<16x96xbf16> to vector<8x8xbf16>
    %cst_102 = arith.constant dense<0.000000e+00> : vector<8x8xf32>
    %237 = tpu.matmul %235, %236, %cst_102 {dimension_numbers = #tpu.dot_dimension_numbers<[1], [1], [0], [0], [0, 0, 1, 0], [], []>} : vector<8x8xbf16>, vector<8x8xbf16>, vector<8x8xf32> -> vector<8x8xf32>
    %238 = vector.extract_strided_slice %225 {offsets = [8, 0], sizes = [8, 8], strides = [1, 1]} : vector<16x96xbf16> to vector<8x8xbf16>
    %239 = vector.extract_strided_slice %225 {offsets = [8, 32], sizes = [8, 8], strides = [1, 1]} : vector<16x96xbf16> to vector<8x8xbf16>
    %cst_103 = arith.constant dense<0.000000e+00> : vector<8x8xf32>
    %240 = tpu.matmul %238, %239, %cst_103 {dimension_numbers = #tpu.dot_dimension_numbers<[1], [1], [0], [0], [0, 0, 1, 0], [], []>} : vector<8x8xbf16>, vector<8x8xbf16>, vector<8x8xf32> -> vector<8x8xf32>
    %241 = vector.extract_strided_slice %225 {offsets = [8, 8], sizes = [8, 8], strides = [1, 1]} : vector<16x96xbf16> to vector<8x8xbf16>
    %242 = vector.extract_strided_slice %225 {offsets = [8, 40], sizes = [8, 8], strides = [1, 1]} : vector<16x96xbf16> to vector<8x8xbf16>
    %cst_104 = arith.constant dense<0.000000e+00> : vector<8x8xf32>
    %243 = tpu.matmul %241, %242, %cst_104 {dimension_numbers = #tpu.dot_dimension_numbers<[1], [1], [0], [0], [0, 0, 1, 0], [], []>} : vector<8x8xbf16>, vector<8x8xbf16>, vector<8x8xf32> -> vector<8x8xf32>
    %244 = vector.extract_strided_slice %225 {offsets = [8, 16], sizes = [8, 8], strides = [1, 1]} : vector<16x96xbf16> to vector<8x8xbf16>
    %245 = vector.extract_strided_slice %225 {offsets = [8, 48], sizes = [8, 8], strides = [1, 1]} : vector<16x96xbf16> to vector<8x8xbf16>
    %cst_105 = arith.constant dense<0.000000e+00> : vector<8x8xf32>
    %246 = tpu.matmul %244, %245, %cst_105 {dimension_numbers = #tpu.dot_dimension_numbers<[1], [1], [0], [0], [0, 0, 1, 0], [], []>} : vector<8x8xbf16>, vector<8x8xbf16>, vector<8x8xf32> -> vector<8x8xf32>
    %247 = vector.extract_strided_slice %225 {offsets = [8, 24], sizes = [8, 8], strides = [1, 1]} : vector<16x96xbf16> to vector<8x8xbf16>
    %248 = vector.extract_strided_slice %225 {offsets = [8, 56], sizes = [8, 8], strides = [1, 1]} : vector<16x96xbf16> to vector<8x8xbf16>
    %cst_106 = arith.constant dense<0.000000e+00> : vector<8x8xf32>
    %249 = tpu.matmul %247, %248, %cst_106 {dimension_numbers = #tpu.dot_dimension_numbers<[1], [1], [0], [0], [0, 0, 1, 0], [], []>} : vector<8x8xbf16>, vector<8x8xbf16>, vector<8x8xf32> -> vector<8x8xf32>
    %250 = tpu.concatenate %228, %231, %234, %237, %240, %243, %246, %249 in 0 : vector<8x8xf32>, vector<8x8xf32>, vector<8x8xf32>, vector<8x8xf32>, vector<8x8xf32>, vector<8x8xf32>, vector<8x8xf32>, vector<8x8xf32> -> vector<64x8xf32>
    %cst_107 = arith.constant 0.353553385 : f32
    %251 = vector.broadcast %cst_107 : f32 to vector<64x8xf32>
    %252 = arith.mulf %250, %251 : vector<64x8xf32>
    %253 = arith.addf %252, %50 : vector<64x8xf32>
    %cst_108 = arith.constant dense<0xFF800000> : vector<64xf32>
    %254 = vector.multi_reduction <maximumf>, %253, %cst_108 [1] : vector<64x8xf32> to vector<64xf32>
    %255 = vector.shape_cast %254 : vector<64xf32> to vector<64x1xf32>
    %256 = vector.broadcast %255 : vector<64x1xf32> to vector<64x8xf32>
    %257 = arith.subf %253, %256 : vector<64x8xf32>
    %258 = math.exp %257 : vector<64x8xf32>
    %cst_109 = arith.constant dense<0.000000e+00> : vector<64xf32>
    %259 = vector.multi_reduction <add>, %258, %cst_109 [1] : vector<64x8xf32> to vector<64xf32>
    %260 = vector.shape_cast %259 : vector<64xf32> to vector<64x1xf32>
    %261 = tpu.reciprocal %260 {approx = true} : vector<64x1xf32> -> vector<64x1xf32>
    %262 = vector.broadcast %261 : vector<64x1xf32> to vector<64x8xf32>
    %263 = arith.mulf %258, %262 : vector<64x8xf32>
    %264 = arith.truncf %263 : vector<64x8xf32> to vector<64x8xbf16>
    %265 = vector.extract_strided_slice %264 {offsets = [0, 0], sizes = [8, 8], strides = [1, 1]} : vector<64x8xbf16> to vector<8x8xbf16>
    %266 = vector.extract_strided_slice %225 {offsets = [0, 64], sizes = [8, 8], strides = [1, 1]} : vector<16x96xbf16> to vector<8x8xbf16>
    %cst_110 = arith.constant dense<0.000000e+00> : vector<8x8xf32>
    %267 = tpu.matmul %265, %266, %cst_110 {dimension_numbers = #tpu.dot_dimension_numbers<[1], [0], [0], [1], [0, 0, 1, 1], [], []>} : vector<8x8xbf16>, vector<8x8xbf16>, vector<8x8xf32> -> vector<8x8xf32>
    %268 = vector.extract_strided_slice %264 {offsets = [8, 0], sizes = [8, 8], strides = [1, 1]} : vector<64x8xbf16> to vector<8x8xbf16>
    %269 = vector.extract_strided_slice %225 {offsets = [0, 72], sizes = [8, 8], strides = [1, 1]} : vector<16x96xbf16> to vector<8x8xbf16>
    %cst_111 = arith.constant dense<0.000000e+00> : vector<8x8xf32>
    %270 = tpu.matmul %268, %269, %cst_111 {dimension_numbers = #tpu.dot_dimension_numbers<[1], [0], [0], [1], [0, 0, 1, 1], [], []>} : vector<8x8xbf16>, vector<8x8xbf16>, vector<8x8xf32> -> vector<8x8xf32>
    %271 = vector.extract_strided_slice %264 {offsets = [16, 0], sizes = [8, 8], strides = [1, 1]} : vector<64x8xbf16> to vector<8x8xbf16>
    %272 = vector.extract_strided_slice %225 {offsets = [0, 80], sizes = [8, 8], strides = [1, 1]} : vector<16x96xbf16> to vector<8x8xbf16>
    %cst_112 = arith.constant dense<0.000000e+00> : vector<8x8xf32>
    %273 = tpu.matmul %271, %272, %cst_112 {dimension_numbers = #tpu.dot_dimension_numbers<[1], [0], [0], [1], [0, 0, 1, 1], [], []>} : vector<8x8xbf16>, vector<8x8xbf16>, vector<8x8xf32> -> vector<8x8xf32>
    %274 = vector.extract_strided_slice %264 {offsets = [24, 0], sizes = [8, 8], strides = [1, 1]} : vector<64x8xbf16> to vector<8x8xbf16>
    %275 = vector.extract_strided_slice %225 {offsets = [0, 88], sizes = [8, 8], strides = [1, 1]} : vector<16x96xbf16> to vector<8x8xbf16>
    %cst_113 = arith.constant dense<0.000000e+00> : vector<8x8xf32>
    %276 = tpu.matmul %274, %275, %cst_113 {dimension_numbers = #tpu.dot_dimension_numbers<[1], [0], [0], [1], [0, 0, 1, 1], [], []>} : vector<8x8xbf16>, vector<8x8xbf16>, vector<8x8xf32> -> vector<8x8xf32>
    %277 = tpu.concatenate %267, %270, %273, %276 in 1 : vector<8x8xf32>, vector<8x8xf32>, vector<8x8xf32>, vector<8x8xf32> -> vector<8x32xf32>
    %278 = vector.extract_strided_slice %264 {offsets = [32, 0], sizes = [8, 8], strides = [1, 1]} : vector<64x8xbf16> to vector<8x8xbf16>
    %279 = vector.extract_strided_slice %225 {offsets = [8, 64], sizes = [8, 8], strides = [1, 1]} : vector<16x96xbf16> to vector<8x8xbf16>
    %cst_114 = arith.constant dense<0.000000e+00> : vector<8x8xf32>
    %280 = tpu.matmul %278, %279, %cst_114 {dimension_numbers = #tpu.dot_dimension_numbers<[1], [0], [0], [1], [0, 0, 1, 1], [], []>} : vector<8x8xbf16>, vector<8x8xbf16>, vector<8x8xf32> -> vector<8x8xf32>
    %281 = vector.extract_strided_slice %264 {offsets = [40, 0], sizes = [8, 8], strides = [1, 1]} : vector<64x8xbf16> to vector<8x8xbf16>
    %282 = vector.extract_strided_slice %225 {offsets = [8, 72], sizes = [8, 8], strides = [1, 1]} : vector<16x96xbf16> to vector<8x8xbf16>
    %cst_115 = arith.constant dense<0.000000e+00> : vector<8x8xf32>
    %283 = tpu.matmul %281, %282, %cst_115 {dimension_numbers = #tpu.dot_dimension_numbers<[1], [0], [0], [1], [0, 0, 1, 1], [], []>} : vector<8x8xbf16>, vector<8x8xbf16>, vector<8x8xf32> -> vector<8x8xf32>
    %284 = vector.extract_strided_slice %264 {offsets = [48, 0], sizes = [8, 8], strides = [1, 1]} : vector<64x8xbf16> to vector<8x8xbf16>
    %285 = vector.extract_strided_slice %225 {offsets = [8, 80], sizes = [8, 8], strides = [1, 1]} : vector<16x96xbf16> to vector<8x8xbf16>
    %cst_116 = arith.constant dense<0.000000e+00> : vector<8x8xf32>
    %286 = tpu.matmul %284, %285, %cst_116 {dimension_numbers = #tpu.dot_dimension_numbers<[1], [0], [0], [1], [0, 0, 1, 1], [], []>} : vector<8x8xbf16>, vector<8x8xbf16>, vector<8x8xf32> -> vector<8x8xf32>
    %287 = vector.extract_strided_slice %264 {offsets = [56, 0], sizes = [8, 8], strides = [1, 1]} : vector<64x8xbf16> to vector<8x8xbf16>
    %288 = vector.extract_strided_slice %225 {offsets = [8, 88], sizes = [8, 8], strides = [1, 1]} : vector<16x96xbf16> to vector<8x8xbf16>
    %cst_117 = arith.constant dense<0.000000e+00> : vector<8x8xf32>
    %289 = tpu.matmul %287, %288, %cst_117 {dimension_numbers = #tpu.dot_dimension_numbers<[1], [0], [0], [1], [0, 0, 1, 1], [], []>} : vector<8x8xbf16>, vector<8x8xbf16>, vector<8x8xf32> -> vector<8x8xf32>
    %290 = tpu.concatenate %280, %283, %286, %289 in 1 : vector<8x8xf32>, vector<8x8xf32>, vector<8x8xf32>, vector<8x8xf32> -> vector<8x32xf32>
    %291 = tpu.concatenate %277, %290 in 0 : vector<8x32xf32>, vector<8x32xf32> -> vector<16x32xf32>
    %292 = arith.truncf %291 : vector<16x32xf32> to vector<16x32xbf16>
    %c1_118 = arith.constant 1 : index
    %c0_119 = arith.constant 0 : index
    %c0_120 = arith.constant 0 : index
    %293 = vector.load %arg9[%c1_118, %c0_119, %c0_120] : memref<2x32x32xbf16, #tpu.memory_space<vmem>>, vector<1x32x32xbf16>
    %294 = vector.shape_cast %293 : vector<1x32x32xbf16> to vector<32x32xbf16>
    %cst_121 = arith.constant dense<0.000000e+00> : vector<16x32xf32>
    %295 = tpu.matmul %292, %294, %cst_121 {dimension_numbers = #tpu.dot_dimension_numbers<[1], [0], [0], [1], [0, 0, 1, 1], [], []>} : vector<16x32xbf16>, vector<32x32xbf16>, vector<16x32xf32> -> vector<16x32xf32>
    %c1_122 = arith.constant 1 : index
    %c0_123 = arith.constant 0 : index
    %c0_124 = arith.constant 0 : index
    %296 = vector.load %arg10[%c1_122, %c0_123, %c0_124] : memref<2x1x32xf32, #tpu.memory_space<vmem>>, vector<1x1x32xf32>
    %297 = vector.shape_cast %296 : vector<1x1x32xf32> to vector<1x32xf32>
    %298 = vector.broadcast %297 : vector<1x32xf32> to vector<16x32xf32>
    %299 = arith.addf %295, %298 : vector<16x32xf32>
    %300 = arith.addf %299, %216 : vector<16x32xf32>
    %c1_125 = arith.constant 1 : index
    %c0_126 = arith.constant 0 : index
    %c0_127 = arith.constant 0 : index
    %301 = vector.load %arg11[%c1_125, %c0_126, %c0_127] : memref<2x1x32xf32, #tpu.memory_space<vmem>>, vector<1x1x32xf32>
    %302 = vector.shape_cast %301 : vector<1x1x32xf32> to vector<1x32xf32>
    %c1_128 = arith.constant 1 : index
    %c0_129 = arith.constant 0 : index
    %c0_130 = arith.constant 0 : index
    %303 = vector.load %arg12[%c1_128, %c0_129, %c0_130] : memref<2x1x32xf32, #tpu.memory_space<vmem>>, vector<1x1x32xf32>
    %304 = vector.shape_cast %303 : vector<1x1x32xf32> to vector<1x32xf32>
    %cst_131 = arith.constant dense<0.000000e+00> : vector<16xf32>
    %305 = vector.multi_reduction <add>, %300, %cst_131 [1] : vector<16x32xf32> to vector<16xf32>
    %306 = vector.shape_cast %305 : vector<16xf32> to vector<16x1xf32>
    %cst_132 = arith.constant 3.200000e+01 : f32
    %307 = vector.broadcast %cst_132 : f32 to vector<16x1xf32>
    %308 = arith.divf %306, %307 : vector<16x1xf32>
    %309 = vector.broadcast %308 : vector<16x1xf32> to vector<16x32xf32>
    %310 = arith.subf %300, %309 : vector<16x32xf32>
    %311 = arith.mulf %310, %310 : vector<16x32xf32>
    %cst_133 = arith.constant dense<0.000000e+00> : vector<16xf32>
    %312 = vector.multi_reduction <add>, %311, %cst_133 [1] : vector<16x32xf32> to vector<16xf32>
    %313 = vector.shape_cast %312 : vector<16xf32> to vector<16x1xf32>
    %cst_134 = arith.constant 3.200000e+01 : f32
    %314 = vector.broadcast %cst_134 : f32 to vector<16x1xf32>
    %315 = arith.divf %313, %314 : vector<16x1xf32>
    %316 = vector.broadcast %308 : vector<16x1xf32> to vector<16x32xf32>
    %317 = arith.subf %300, %316 : vector<16x32xf32>
    %cst_135 = arith.constant 9.99999996E-13 : f32
    %318 = vector.broadcast %cst_135 : f32 to vector<16x1xf32>
    %319 = arith.addf %315, %318 : vector<16x1xf32>
    %320 = math.rsqrt %319 : vector<16x1xf32>
    %321 = vector.broadcast %320 : vector<16x1xf32> to vector<16x32xf32>
    %322 = arith.mulf %317, %321 : vector<16x32xf32>
    %323 = vector.broadcast %302 : vector<1x32xf32> to vector<16x32xf32>
    %324 = arith.mulf %322, %323 : vector<16x32xf32>
    %325 = vector.broadcast %304 : vector<1x32xf32> to vector<16x32xf32>
    %326 = arith.addf %324, %325 : vector<16x32xf32>
    %327 = arith.truncf %326 : vector<16x32xf32> to vector<16x32xbf16>
    %c1_136 = arith.constant 1 : index
    %c0_137 = arith.constant 0 : index
    %c0_138 = arith.constant 0 : index
    %328 = vector.load %arg13[%c1_136, %c0_137, %c0_138] : memref<2x32x64xbf16, #tpu.memory_space<vmem>>, vector<1x32x64xbf16>
    %329 = vector.shape_cast %328 : vector<1x32x64xbf16> to vector<32x64xbf16>
    %cst_139 = arith.constant dense<0.000000e+00> : vector<16x64xf32>
    %330 = tpu.matmul %327, %329, %cst_139 {dimension_numbers = #tpu.dot_dimension_numbers<[1], [0], [0], [1], [0, 0, 1, 1], [], []>} : vector<16x32xbf16>, vector<32x64xbf16>, vector<16x64xf32> -> vector<16x64xf32>
    %c1_140 = arith.constant 1 : index
    %c0_141 = arith.constant 0 : index
    %c0_142 = arith.constant 0 : index
    %331 = vector.load %arg14[%c1_140, %c0_141, %c0_142] : memref<2x1x64xf32, #tpu.memory_space<vmem>>, vector<1x1x64xf32>
    %332 = vector.shape_cast %331 : vector<1x1x64xf32> to vector<1x64xf32>
    %333 = vector.broadcast %332 : vector<1x64xf32> to vector<16x64xf32>
    %334 = arith.addf %330, %333 : vector<16x64xf32>
    %cst_143 = arith.constant 5.000000e-01 : f32
    %335 = vector.broadcast %cst_143 : f32 to vector<16x64xf32>
    %336 = arith.mulf %335, %334 : vector<16x64xf32>
    %cst_144 = arith.constant 4.471500e-02 : f32
    %337 = vector.broadcast %cst_144 : f32 to vector<16x64xf32>
    %338 = arith.mulf %337, %334 : vector<16x64xf32>
    %339 = arith.mulf %338, %334 : vector<16x64xf32>
    %340 = arith.mulf %339, %334 : vector<16x64xf32>
    %341 = arith.addf %334, %340 : vector<16x64xf32>
    %cst_145 = arith.constant 0.797884583 : f32
    %342 = vector.broadcast %cst_145 : f32 to vector<16x64xf32>
    %343 = arith.mulf %342, %341 : vector<16x64xf32>
    %344 = math.tanh %343 : vector<16x64xf32>
    %cst_146 = arith.constant 1.000000e+00 : f32
    %345 = vector.broadcast %cst_146 : f32 to vector<16x64xf32>
    %346 = arith.addf %345, %344 : vector<16x64xf32>
    %347 = arith.mulf %336, %346 : vector<16x64xf32>
    %348 = arith.truncf %347 : vector<16x64xf32> to vector<16x64xbf16>
    %c1_147 = arith.constant 1 : index
    %c0_148 = arith.constant 0 : index
    %c0_149 = arith.constant 0 : index
    %349 = vector.load %arg15[%c1_147, %c0_148, %c0_149] : memref<2x64x32xbf16, #tpu.memory_space<vmem>>, vector<1x64x32xbf16>
    %350 = vector.shape_cast %349 : vector<1x64x32xbf16> to vector<64x32xbf16>
    %cst_150 = arith.constant dense<0.000000e+00> : vector<16x32xf32>
    %351 = tpu.matmul %348, %350, %cst_150 {dimension_numbers = #tpu.dot_dimension_numbers<[1], [0], [0], [1], [0, 0, 1, 1], [], []>} : vector<16x64xbf16>, vector<64x32xbf16>, vector<16x32xf32> -> vector<16x32xf32>
    %c1_151 = arith.constant 1 : index
    %c0_152 = arith.constant 0 : index
    %c0_153 = arith.constant 0 : index
    %352 = vector.load %arg16[%c1_151, %c0_152, %c0_153] : memref<2x1x32xf32, #tpu.memory_space<vmem>>, vector<1x1x32xf32>
    %353 = vector.shape_cast %352 : vector<1x1x32xf32> to vector<1x32xf32>
    %354 = vector.broadcast %353 : vector<1x32xf32> to vector<16x32xf32>
    %355 = arith.addf %351, %354 : vector<16x32xf32>
    %356 = arith.addf %355, %326 : vector<16x32xf32>
    %c1_154 = arith.constant 1 : index
    %c0_155 = arith.constant 0 : index
    %c0_156 = arith.constant 0 : index
    %357 = vector.load %arg17[%c1_154, %c0_155, %c0_156] : memref<2x1x32xf32, #tpu.memory_space<vmem>>, vector<1x1x32xf32>
    %358 = vector.shape_cast %357 : vector<1x1x32xf32> to vector<1x32xf32>
    %c1_157 = arith.constant 1 : index
    %c0_158 = arith.constant 0 : index
    %c0_159 = arith.constant 0 : index
    %359 = vector.load %arg18[%c1_157, %c0_158, %c0_159] : memref<2x1x32xf32, #tpu.memory_space<vmem>>, vector<1x1x32xf32>
    %360 = vector.shape_cast %359 : vector<1x1x32xf32> to vector<1x32xf32>
    %cst_160 = arith.constant dense<0.000000e+00> : vector<16xf32>
    %361 = vector.multi_reduction <add>, %356, %cst_160 [1] : vector<16x32xf32> to vector<16xf32>
    %362 = vector.shape_cast %361 : vector<16xf32> to vector<16x1xf32>
    %cst_161 = arith.constant 3.200000e+01 : f32
    %363 = vector.broadcast %cst_161 : f32 to vector<16x1xf32>
    %364 = arith.divf %362, %363 : vector<16x1xf32>
    %365 = vector.broadcast %364 : vector<16x1xf32> to vector<16x32xf32>
    %366 = arith.subf %356, %365 : vector<16x32xf32>
    %367 = arith.mulf %366, %366 : vector<16x32xf32>
    %cst_162 = arith.constant dense<0.000000e+00> : vector<16xf32>
    %368 = vector.multi_reduction <add>, %367, %cst_162 [1] : vector<16x32xf32> to vector<16xf32>
    %369 = vector.shape_cast %368 : vector<16xf32> to vector<16x1xf32>
    %cst_163 = arith.constant 3.200000e+01 : f32
    %370 = vector.broadcast %cst_163 : f32 to vector<16x1xf32>
    %371 = arith.divf %369, %370 : vector<16x1xf32>
    %372 = vector.broadcast %364 : vector<16x1xf32> to vector<16x32xf32>
    %373 = arith.subf %356, %372 : vector<16x32xf32>
    %cst_164 = arith.constant 9.99999996E-13 : f32
    %374 = vector.broadcast %cst_164 : f32 to vector<16x1xf32>
    %375 = arith.addf %371, %374 : vector<16x1xf32>
    %376 = math.rsqrt %375 : vector<16x1xf32>
    %377 = vector.broadcast %376 : vector<16x1xf32> to vector<16x32xf32>
    %378 = arith.mulf %373, %377 : vector<16x32xf32>
    %379 = vector.broadcast %358 : vector<1x32xf32> to vector<16x32xf32>
    %380 = arith.mulf %378, %379 : vector<16x32xf32>
    %381 = vector.broadcast %360 : vector<1x32xf32> to vector<16x32xf32>
    %382 = arith.addf %380, %381 : vector<16x32xf32>
    %383 = vector.extract_strided_slice %382 {offsets = [0, 0], sizes = [1, 32], strides = [1, 1]} : vector<16x32xf32> to vector<1x32xf32>
    %384 = vector.extract_strided_slice %382 {offsets = [8, 0], sizes = [1, 32], strides = [1, 1]} : vector<16x32xf32> to vector<1x32xf32>
    %385 = tpu.concatenate %383, %384 in 0 : vector<1x32xf32>, vector<1x32xf32> -> vector<2x32xf32>
    %386 = arith.truncf %385 : vector<2x32xf32> to vector<2x32xbf16>
    %c0_165 = arith.constant 0 : index
    %c0_166 = arith.constant 0 : index
    %387 = vector.load %arg19[%c0_165, %c0_166] : memref<32x128xbf16, #tpu.memory_space<vmem>>, vector<32x128xbf16>
    %cst_167 = arith.constant dense<0.000000e+00> : vector<2x128xf32>
    %388 = tpu.matmul %386, %387, %cst_167 {dimension_numbers = #tpu.dot_dimension_numbers<[1], [0], [0], [1], [0, 0, 1, 1], [], []>} : vector<2x32xbf16>, vector<32x128xbf16>, vector<2x128xf32> -> vector<2x128xf32>
    %c0_168 = arith.constant 0 : index
    %c0_169 = arith.constant 0 : index
    %389 = vector.load %arg20[%c0_168, %c0_169] : memref<1x128xf32, #tpu.memory_space<vmem>>, vector<1x128xf32>
    %390 = vector.broadcast %389 : vector<1x128xf32> to vector<2x128xf32>
    %391 = arith.addf %388, %390 : vector<2x128xf32>
    %c0_170 = arith.constant 0 : index
    %c0_171 = arith.constant 0 : index
    %392 = vector.load %arg21[%c0_170, %c0_171] : memref<2x128xf32, #tpu.memory_space<vmem>>, vector<2x128xf32>
    tpu.vector_store %arg21[%c0_170, %c0_171], %391 {strides = array<i32>} : memref<2x128xf32, #tpu.memory_space<vmem>>, vector<2x128xf32>,
    return
  }
}

</mosaic_0001>

<bundles_post_ra>
// kernel: bert_address_parser_forward.1
= control target key start
LH: loop header
LB: loop body
LE: loop exit
PB: predicated region body
PF: predicated region fallthrough
CT: control target
= control target key end

     0   :  { %v3710_v0 = vmov 0   ;;  %v3711_v9 = vmov 0.0   ;;  %vm106_vm0 = vcmask 1043456   ;;  %v69_v23 = vlaneseq  ;;  %s3714_s29 = smov 96   ;;  %s3717_s30 = smov 120   ;;  %s4504_s0 = inlined_call_operand.vmem [shape: s32[16,1], index: 0, kind: input, shape index: {}]   ;;  %s4505_s2 = inlined_call_operand.vmem [shape: f32[100,32], index: 2, kind: input, shape index: {}]   ;;  %s4506_s3 = inlined_call_operand.vmem [shape: f32[16,32], index: 3, kind: input, shape index: {}]   ;;  %s4507_s4 = inlined_call_operand.vmem [shape: f32[2,32], index: 4, kind: input, shape index: {}]   ;;  %s4508_s7 = inlined_call_operand.vmem [shape: bf16[2,32,96], index: 7, kind: input, shape index: {}]   ;;  %s4509_s5 = inlined_call_operand.vmem [shape: f32[1,32], index: 5, kind: input, shape index: {}]   ;;  %s4510_s6 = inlined_call_operand.vmem [shape: f32[1,32], index: 6, kind: input, shape index: {}]   ;;  %s4511_s8 = inlined_call_operand.vmem [shape: f32[2,1,96], index: 8, kind: input, shape index: {}]   ;;  %s4512_s1 = inlined_call_operand.vmem [shape: s32[2,8], index: 1, kind: input, shape index: {}]   ;;  %s4513_s9 = inlined_call_operand.vmem [shape: bf16[2,32,32], index: 9, kind: input, shape index: {}]   ;;  %s4514_s10 = inlined_call_operand.vmem [shape: f32[2,1,32], index: 10, kind: input, shape index: {}]   ;;  %s4515_s13 = inlined_call_operand.vmem [shape: bf16[2,32,64], index: 13, kind: input, shape index: {}]   ;;  %s4516_s11 = inlined_call_operand.vmem [shape: f32[2,1,32], index: 11, kind: input, shape index: {}]   ;;  %s4517_s12 = inlined_call_operand.vmem [shape: f32[2,1,32], index: 12, kind: input, shape index: {}]   ;;  %s4518_s15 = inlined_call_operand.vmem [shape: bf16[2,64,32], index: 15, kind: input, shape index: {}]   ;;  %s4519_s14 = inlined_call_operand.vmem [shape: f32[2,1,64], index: 14, kind: input, shape index: {}]   ;;  %s4520_s16 = inlined_call_operand.vmem [shape: f32[2,1,32], index: 16, kind: input, shape index: {}]   ;;  %s4521_s17 = inlined_call_operand.vmem [shape: f32[2,1,32], index: 17, kind: input, shape index: {}]   ;;  %s4522_s18 = inlined_call_operand.vmem [shape: f32[2,1,32], index: 18, kind: input, shape index: {}]   ;;  %s4523_s19 = inlined_call_operand.vmem [shape: bf16[32,128], index: 19, kind: input, shape index: {}]   ;;  %s4524_s20 = inlined_call_operand.vmem [shape: f32[1,128], index: 20, kind: input, shape index: {}]   ;;  %s4525_s21 = inlined_call_operand.vmem [shape: f32[2,128], index: 21, kind: output, shape index: {}]  }
   0x1   :  { %4538 = sst [smem:[#allocation2_spill]] %s4504_s0  ;;  %3565 = vset.pattern.permute.xlu0 %v3710_v0  ;;  %3252 = vmatprep.subr.bf16.mxu1 %v3711_v9  ;;  %vm99_vm1 = vcmask 818176   ;;  %vm194_vm4 = vcmask 261120   ;;  %vm3712_vm5 = vmmov 0   ;;  %v3004_v63 = vld [vmem:[%s4510_s6] ss:$0 sm:$0xff] }
   0x2   :  { %4539 = sst [smem:[#allocation3_spill]] %s4505_s2  ;;  %s4544_s26 = sld [smem:[#allocation2_spill]]  ;;  %v70_v24 = vand.u32 127, %v69_v23  ;;  %3256 = vmatprep.mubr.msk.bf16.mxu1 %vm3712_vm5, %v3711_v9  ;;  %vm322_vm6 = vcmask 64512   ;;  %vm1035_vm7 = vcmask 130048   ;;  %vm1037_vm8 = vcmask 195584  }
   0x3   :  { %4540 = sst [smem:[#allocation4_spill]] %s4506_s3  ;;  %s4545_s28 = sld [smem:[#allocation3_spill]]  ;;  %vm1490_vm9 = vcmask 523264   ;;  %vm2923_vm10 = vcmask 1040384  }
   0x4   :  { %4541 = sst [smem:[#allocation5_spill]] %s4507_s4  ;;  %s3713_s6 = smov 72  }
   0x5   :  { %4542 = sst [smem:[#allocation6_spill]] %s4508_s7  ;;  %s4547_s7 = sld [smem:[#allocation5_spill]] }
   0x6   :  { %4543 = sst [smem:[#allocation7_spill]] %s4509_s5  ;;  %s4548_s22 = sld [smem:[#allocation6_spill]] }
   0x7   :  { %s4549_s25 = sld [smem:[#allocation7_spill]]  ;;  %s3715_s0 = smov 88  }
   0x8   :  { %v71_v1 = vld [vmem:[%s4544_s26] sm:$0xff]  ;;  %v72_v6 = vld [vmem:[%s4544_s26 + $0x8] sm:$0xff]  ;;  %s4546_s26 = sld [smem:[#allocation4_spill]]  ;;  %s3718_s5 = smov 112  }
   0x9   :  { %v85_v2 = vld [vmem:[%s4545_s28] sm:$0xff]  ;;  %74 = vperm.xlu0 %3565, %v71_v1   ;;  %v86_v3 = vld [vmem:[%s4545_s28 + $0x8] sm:$0xff]  ;;  %v87_v4 = vld [vmem:[%s4545_s28 + $0x10] sm:$0xff]  ;;  %s3719_s23 = smov 104   ;;  %s4536_s2 = smov 64  }
   0xa   :  { %v88_v5 = vld [vmem:[%s4545_s28 + $0x18] sm:$0xff]  ;;  %v3524_v7 = vpack.c.bf16 %v86_v3, %v85_v2  ;;  %v89_v10 = vld [vmem:[%s4545_s28 + $0x20] sm:$0xff]  ;;  %v90_v11 = vld [vmem:[%s4545_s28 + $0x28] sm:$0xff]  ;;  %s4532_s27 = smov 40   ;;  %s4531_s3 = smov 8  }
   0xb   :  { %v3528_v8 = vpack.c.bf16 %v88_v5, %v87_v4  ;;  %v3532_v12 = vpack.c.bf16 %v90_v11, %v89_v10  ;;  %v91_v13 = vld [vmem:[%s4545_s28 + $0x30] sm:$0xff]  ;;  %v92_v14 = vld [vmem:[%s4545_s28 + $0x38] sm:$0xff]  ;;  %v93_v16 = vld [vmem:[%s4545_s28 + $0x40] sm:$0xff]  ;;  %s4529_s4 = smov 24  }
   0xc   :  { %3525 = vmatprep.subr.bf16.mxu0 %v3524_v7  ;;  %v3536_v15 = vpack.c.bf16 %v92_v14, %v91_v13  ;;  %v94_v17 = vld [vmem:[%s4545_s28 + $0x48] sm:$0xff]  ;;  %v95_v19 = vld [vmem:[%s4545_s28 + $0x50] sm:$0xff]  ;;  %v96_v20 = vld [vmem:[%s4545_s28 + $0x58] sm:$0xff] }
   0xd   :  { %77 = vperm.xlu0 %3565, %v72_v6   ;;  %3527 = vmatpush3.bf16.msra.mxu0 %v3524_v7  ;;  %v3540_v18 = vpack.c.bf16 %v94_v17, %v93_v16  ;;  %v3544_v21 = vpack.c.bf16 %v96_v20, %v95_v19  ;;  %v97_v22 = vld [vmem:[%s4545_s28 + $0x60] sm:$0xf]  ;;  %v3597_v50 = vld [vmem:[%s4548_s22 + $0x8] sm:$0xff]   ;;  %s4530_s28 = smov 16  }
   0xe   :  { %3529 = vmatprep.subr.bf16.mxu0 %v3528_v8  ;;  %v98_v29 = vld [vmem:[%s4546_s26] sm:$0xff] }
   0xf   :  { %v3002_v32 = vld [vmem:[%s4547_s7] ss:$0 sm:$0xff]  ;;  %s3716_s7 = smov 80  }
  0x10   :  { %v3596_v49 = vld [vmem:[%s4548_s22] sm:$0xff]  }
  0x11   :  { %3531 = vmatpush3.bf16.msra.mxu0 %v3528_v8  ;;  %3253 = vmatpush3.bf16.msra.mxu1 %v3596_v49  ;;  %v3003_v59 = vld [vmem:[%s4549_s25] ss:$0 sm:$0xff]  ;;  %s3722_s25 = smov 56  }
  0x12   :  { %3533 = vmatprep.subr.bf16.mxu0 %v3532_v12  ;;  %3254 = vmatprep.subr.bf16.mxu1 %v3711_v9  ;;  %v3005_v4 = vld [vmem:[%s4511_s8] ss:$0 sm:$0xff] }
  0x15   :  { %3535 = vmatpush3.bf16.msra.mxu0 %v3532_v12  ;;  %3255 = vmatpush3.bf16.msra.mxu1 %v3597_v50 }
  0x16   :  { %3537 = vmatprep.subr.bf16.mxu0 %v3536_v15  ;;  %3260 = vmatprep.subr.bf16.mxu1 %v3711_v9 }
  0x19   :  { %3539 = vmatpush3.bf16.msra.mxu0 %v3536_v15 }
  0x1a   :  { %3541 = vmatprep.subr.bf16.mxu0 %v3540_v18 }
  0x1d   :  { %3543 = vmatpush3.bf16.msra.mxu0 %v3540_v18 }
  0x1e   :  { %3545 = vmatprep.subr.bf16.mxu0 %v3544_v21 }
  0x21   :  { %3547 = vmatpush3.bf16.msra.mxu0 %v3544_v21 }
  0x22   :  { %3247 = vmatprep.subr.msk.mxu0 %vm106_vm0, %v97_v22 }
  0x25   :  { %3248 = vmatpush3.msk.msra.mxu0 %vm106_vm0, %v97_v22 }
  0x26   :  { %3278 = vmatprep.subr.bf16.mxu0 %v3711_v9 }
  0x88   :  { %v75_v25 = vpop.permute.xlu0 %74 }
  0x89   :  { %vm79_vm2 = vcmp.eq.s32.totalorder %v70_v24, %v75_v25 }
  0x8a   :  { %v2997_v26 = vsel %vm79_vm2, 1.0, %v3711_v9 }
  0x8b   :  { %3249 = vmatprep.mubr.msk.f32.mxu0 %vm99_vm1, %v2997_v26 }
  0x8c   :  { %v78_v27 = vpop.permute.xlu0 %77 }
  0x8d   :  { %vm80_vm3 = vcmp.eq.s32.totalorder %v70_v24, %v78_v27 }
  0x8e   :  { %v2998_v28 = vsel %vm80_vm3, 1.0, %v3711_v9 }
  0x8f   :  { %3250 = vmatmul.mubr.msk.f32.vlgmr.msra.gmra.mrb[0].mxu0 %vm99_vm1, %v2998_v28 }
  0x90   :  { %3280 = vmatprep.mubr.msk.bf16.mxu0 %vm3712_vm5, %v3711_v9 }
 0x162   :  { %v3251_v30 = vpop.f32.mrb[0].mxu0 }
 0x163   :  { %v176_v31 = vpop.f32.mrb[1].mxu0  ;;  %v182_v33 = vadd.f32 %v3251_v30, %v98_v29 }
 0x164   :  { %v177_v34 = vadd.f32 %v176_v31, %v98_v29 }
 0x165   :  { %v191_v37 = vadd.f32 %v3002_v32, %v182_v33 }
 0x166   :  { %v190_v35 = vadd.f32 %v3002_v32, %v177_v34 }
 0x167   :  { %v198_v38 = vsel %vm194_vm4, %v191_v37, 0.0 }
 0x168   :  { %v195_v36 = vsel %vm194_vm4, %v190_v35, 0.0 }
 0x169   :  { %196 = vadd.xlane.f32.xlu1 %v195_v36 }
 0x16d   :  { %199 = vadd.xlane.f32.xlu1 %v198_v38 }
 0x1f6   :  { %v197_v39 = vpop.xlane.xlu1 %196 }
 0x1f7   :  { %v202_v40 = vmul.f32 0.03125, %v197_v39  ;;  %v238_v39 = vld [vmem:[%s4512_s1] sm:$0x3]  ;;  %s4534_s1 = smov 48  }
 0x1f9   :  { %v204_v41 = vsub.f32 %v190_v35, %v202_v40  ;;  %v239_v40 = vcvt.s32.f32 %v238_v39 }
 0x1fa   :  { %v200_v42 = vpop.xlane.xlu1 %199 }
 0x1fb   :  { %v203_v43 = vmul.f32 0.03125, %v200_v42  ;;  %v206_v44 = vmul.f32 %v204_v41, %v204_v41  ;;  %v243_v42 = vshrl.u32 %v69_v23, 7 }
 0x1fd   :  { %v205_v45 = vsub.f32 %v191_v37, %v203_v43  ;;  %v208_v46 = vsel %vm194_vm4, %v206_v44, 0.0  ;;  %v244_v44 = vsub.s32 0, %v243_v42 }
 0x1fe   :  { %209 = vadd.xlane.f32.xlu0 %v208_v46 }
 0x1ff   :  { %v207_v47 = vmul.f32 %v205_v45, %v205_v45 }
 0x201   :  { %v211_v48 = vsel %vm194_vm4, %v207_v47, 0.0 }
 0x202   :  { %212 = vadd.xlane.f32.xlu1 %v211_v48 }
 0x28b   :  { %v210_v51 = vpop.xlane.xlu0 %209 }
 0x28c   :  { %v214_v52 = vmul.f32 0.03125, %v210_v51 }
 0x28e   :  { %v216_v53 = vadd.f32 1e-12, %v214_v52 }
 0x28f   :  { %v213_v54 = vpop.xlane.xlu1 %212 }
 0x290   :  { %3618 = vrsqrt.f32 %v216_v53  ;;  %v215_v55 = vmul.f32 0.03125, %v213_v54 }
 0x292   :  { %v217_v56 = vadd.f32 1e-12, %v215_v55 }
 0x294   :  { %3620 = vrsqrt.f32 %v217_v56 }
 0x29a   :  { %v3619_v57 = vpop.eup %3618 }
 0x29b   :  { %v220_v58 = vmul.f32 %v3619_v57, %v204_v41  ;;  %v240_v41 = vsub.f32 1.0, %v239_v40 }
 0x29d   :  { %v228_v62 = vmul.f32 %v3003_v59, %v220_v58  ;;  %v241_v43 = vmul.f32 -1e+09, %v240_v41 }
 0x29e   :  { %v3621_v60 = vpop.eup %3620 }
 0x29f   :  { %v221_v61 = vmul.f32 %v3621_v60, %v205_v45  ;;  %v3917_v1 = vadd.f32 %v3004_v63, %v228_v62  ;;  %v4012_v45 = vrot.slane %v241_v43, %v244_v44 }
 0x2a1   :  { %v229_v0 = vmul.f32 %v3003_v59, %v221_v61 }
 0x2a3   :  { %v3919_v2 = vadd.f32 %v3004_v63, %v229_v0 }
 0x2a5   :  { %v250_v3 = vpack.c.bf16 %v3919_v2, %v3917_v1 }
 0x2a7   :  { %3257 = vmatmul.mubr.msk.bf16.vlgmr.msra.gmra.mrb[0].mxu1 %vm194_vm4, %v250_v3 }
 0x2a8   :  { %3262 = vmatprep.mubr.msk.bf16.mxu1 %vm3712_vm5, %v3711_v9 }
 0x37a   :  { %v311_v5 = vpop.f32.mrb[0].mxu1 }
 0x37b   :  { %v3258_v6 = vpop.f32.mrb[1].mxu1  ;;  %v312_v8 = vadd.f32 %v3005_v4, %v311_v5 }
 0x37c   :  { %v314_v7 = vpop.f32.mrb[2].mxu1 }
 0x37d   :  { %v315_v10 = vadd.f32 %v3005_v4, %v314_v7  ;;  %v3259_v11 = vpop.f32.mrb[3].mxu1 }
 0x37f   :  { %v3929_v12 = vpack.c.bf16 %v315_v10, %v312_v8  ;;  %v248_v10 = vsub.s32 1, %v243_v42 }
 0x381   :  { %471 = vrot.lane.b32.xlu0 %v3929_v12, %s3713_s6  ;;  %320 = vrot.lane.b32.xlu1 %v3929_v12, %s3714_s29  ;;  %v3936_v13 = vrot.slane %v3929_v12, 4 }
 0x385   :  { %371 = vrot.lane.b32.xlu1 %v3929_v12, %s3715_s0  ;;  %620 = vrot.lane.b32.xlu0 %v3936_v13, %s3716_s7 }
 0x389   :  { %369 = vrot.lane.b32.xlu1 %v3929_v12, %s3717_s30  ;;  %618 = vrot.lane.b32.xlu0 %v3936_v13, %s3718_s5 }
 0x38d   :  { %421 = vrot.lane.b32.xlu1 %v3929_v12, %s3716_s7 }
 0x391   :  { %419 = vrot.lane.b32.xlu1 %v3929_v12, %s3718_s5 }
 0x395   :  { %469 = vrot.lane.b32.xlu1 %v3929_v12, %s3719_s23 }
 0x399   :  { %520 = vrot.lane.b32.xlu1 %v3936_v13, %s3714_s29 }
 0x39d   :  { %570 = vrot.lane.b32.xlu1 %v3936_v13, %s3715_s0 }
 0x3a1   :  { %568 = vrot.lane.b32.xlu1 %v3936_v13, %s3717_s30 }
 0x3a5   :  { %670 = vrot.lane.b32.xlu1 %v3936_v13, %s3713_s6 }
 0x3a9   :  { %668 = vrot.lane.b32.xlu1 %v3936_v13, %s3719_s23 }
 0x3ad   :  { %826 = vrot.lane.b32.xlu1 %v3929_v12, %s4536_s2 }
 0x3f3   :  { %v472_v14 = vpop.permute.xlu0 %471  ;;  %v321_v15 = vpop.permute.xlu1 %320 }
 0x3f4   :  { %v477_v16 = vsel %vm322_vm6, %v472_v14, 0  ;;  %v327_v17 = vsel %vm322_vm6, %v321_v15, 0 }
 0x3f5   :  { %3261 = vmatpush3.bf16.xpose.msra.mxu1 %v327_v17  ;;  %3279 = vmatpush3.bf16.xpose.msra.mxu0 %v477_v16  ;;  %v4026_v17 = vrot.slane %v241_v43, %v248_v10 }
 0x3f6   :  { %3266 = vmatprep.subr.bf16.mxu1 %v3711_v9  ;;  %3290 = vmatprep.subr.bf16.mxu0 %v3711_v9 }
 0x3f7   :  { %v372_v18 = vpop.permute.xlu1 %371  ;;  %v621_v30 = vpop.permute.xlu0 %620 }
 0x3f8   :  { %v377_v20 = vsel %vm322_vm6, %v372_v18, 0  ;;  %v626_v32 = vsel %vm322_vm6, %v621_v30, 0 }
 0x3fb   :  { %v370_v19 = vpop.permute.xlu1 %369  ;;  %v619_v35 = vpop.permute.xlu0 %618 }
 0x3fc   :  { %3263 = vmatmul.mubr.msk.bf16.vlgmr.msra.gmra.mrb[4].mxu1 %vm322_vm6, %v3929_v12 }
 0x3fd   :  { %3267 = vmatpush3.bf16.xpose.msra.mxu1 %v377_v20  ;;  %3268 = vmatprep.mubr.msk.bf16.mxu1 %vm3712_vm5, %v3711_v9 }
 0x3fe   :  { %3272 = vmatprep.subr.bf16.mxu1 %v3711_v9 }
 0x3ff   :  { %v422_v21 = vpop.permute.xlu1 %421 }
 0x400   :  { %v427_v24 = vsel %vm322_vm6, %v422_v21, 0 }
 0x403   :  { %v420_v22 = vpop.permute.xlu1 %419 }
 0x404   :  { %3269 = vmatmul.mubr.msk.bf16.vlgmr.msra.gmra.mrb[8].mxu1 %vm322_vm6, %v370_v19 }
 0x405   :  { %3273 = vmatpush3.bf16.xpose.msra.mxu1 %v427_v24  ;;  %3274 = vmatprep.mubr.msk.bf16.mxu1 %vm3712_vm5, %v3711_v9 }
 0x406   :  { %3284 = vmatprep.subr.bf16.mxu1 %v3711_v9 }
 0x407   :  { %v470_v25 = vpop.permute.xlu1 %469 }
 0x408   :  { %3281 = vmatmul.mubr.msk.bf16.vlgmr.msra.gmra.mrb[4].mxu0 %vm322_vm6, %v470_v25 }
 0x409   :  { %3292 = vmatprep.mubr.msk.bf16.mxu0 %vm3712_vm5, %v3711_v9 }
 0x40b   :  { %v521_v26 = vpop.permute.xlu1 %520 }
 0x40c   :  { %v526_v27 = vsel %vm322_vm6, %v521_v26, 0  ;;  %3275 = vmatmul.mubr.msk.bf16.vlgmr.msra.gmra.mrb[12].mxu1 %vm322_vm6, %v420_v22 }
 0x40d   :  { %3285 = vmatpush3.bf16.xpose.msra.mxu1 %v526_v27  ;;  %3286 = vmatprep.mubr.msk.bf16.mxu1 %vm3712_vm5, %v3711_v9 }
 0x40e   :  { %3296 = vmatprep.subr.bf16.mxu1 %v3711_v9 }
 0x40f   :  { %v571_v28 = vpop.permute.xlu1 %570 }
 0x410   :  { %v576_v29 = vsel %vm322_vm6, %v571_v28, 0 }
 0x411   :  { %3291 = vmatpush3.bf16.xpose.msra.mxu0 %v576_v29 }
 0x412   :  { %3302 = vmatprep.subr.bf16.mxu0 %v3711_v9 }
 0x413   :  { %v569_v31 = vpop.permute.xlu1 %568 }
 0x414   :  { %3287 = vmatmul.mubr.msk.bf16.vlgmr.msra.gmra.mrb[16].mxu1 %vm322_vm6, %v3936_v13 }
 0x415   :  { %3297 = vmatpush3.bf16.xpose.msra.mxu1 %v626_v32  ;;  %3298 = vmatprep.mubr.msk.bf16.mxu1 %vm3712_vm5, %v3711_v9 }
 0x416   :  { %3308 = vmatprep.subr.bf16.mxu1 %v3711_v9 }
 0x417   :  { %v671_v33 = vpop.permute.xlu1 %670 }
 0x418   :  { %v676_v34 = vsel %vm322_vm6, %v671_v33, 0  ;;  %3293 = vmatmul.mubr.msk.bf16.vlgmr.msra.gmra.mrb[8].mxu0 %vm322_vm6, %v569_v31 }
 0x419   :  { %3303 = vmatpush3.bf16.xpose.msra.mxu0 %v676_v34  ;;  %3304 = vmatprep.mubr.msk.bf16.mxu0 %vm3712_vm5, %v3711_v9 }
 0x41a   :  { %3314 = vmatprep.subr.bf16.mxu0 %v3711_v9 }
 0x41b   :  { %v669_v36 = vpop.permute.xlu1 %668 }
 0x41c   :  { %3299 = vmatmul.mubr.msk.bf16.vlgmr.msra.gmra.mrb[20].mxu1 %vm322_vm6, %v619_v35 }
 0x41d   :  { %3310 = vmatprep.mubr.msk.bf16.mxu1 %vm3712_vm5, %v3711_v9 }
 0x41f   :  { %v827_v37 = vpop.permute.xlu1 %826 }
 0x420   :  { %v832_v38 = vsel %vm106_vm0, %v827_v37, 0  ;;  %3305 = vmatmul.mubr.msk.bf16.vlgmr.msra.gmra.mrb[12].mxu0 %vm322_vm6, %v669_v36 }
 0x421   :  { %3309 = vmatpush3.bf16.msra.mxu1 %v832_v38  ;;  %3316 = vmatprep.mubr.msk.bf16.mxu0 %vm3712_vm5, %v3711_v9 }
 0x422   :  { %3320 = vmatprep.subr.bf16.mxu1 %v3711_v9 }
 0x4cf   :  { %v363_v46 = vpop.f32.mrb[4].mxu1 }
 0x4d0   :  { %v718_v47 = vmul.f32 0.35355338, %v363_v46  ;;  %v3264_v48 = vpop.f32.mrb[5].mxu1 }
 0x4d1   :  { %v366_v49 = vpop.f32.mrb[6].mxu1 }
 0x4d2   :  { %v3265_v50 = vpop.f32.mrb[7].mxu1  ;;  %v4015_v51 = vadd.f32 %v718_v47, %v4012_v45 }
 0x4d4   :  { %v734_v52 = vsel %vm322_vm6, %v4015_v51, -inf }
 0x4d5   :  { %735 = vmax.xlane.f32.xlu0 %v734_v52 }
 0x4d7   :  { %v413_v53 = vpop.f32.mrb[8].mxu1 }
 0x4d8   :  { %v719_v54 = vmul.f32 0.35355338, %v413_v53  ;;  %v3270_v55 = vpop.f32.mrb[9].mxu1 }
 0x4d9   :  { %v416_v23 = vpop.f32.mrb[10].mxu1 }
 0x4da   :  { %v3271_v56 = vpop.f32.mrb[11].mxu1  ;;  %v4020_v57 = vadd.f32 %v719_v54, %v4012_v45 }
 0x4db   :  { %v513_v58 = vpop.f32.mrb[4].mxu0 }
 0x4dc   :  { %v721_v59 = vmul.f32 0.35355338, %v513_v58  ;;  %v3282_v60 = vpop.f32.mrb[5].mxu0  ;;  %v737_v61 = vsel %vm322_vm6, %v4020_v57, -inf }
 0x4dd   :  { %v516_v62 = vpop.f32.mrb[6].mxu0  ;;  %738 = vmax.xlane.f32.xlu1 %v737_v61 }
 0x4de   :  { %v3283_v63 = vpop.f32.mrb[7].mxu0  ;;  %v729_v0 = vadd.f32 %v721_v59, %v4012_v45 }
 0x4df   :  { %v463_v3 = vpop.f32.mrb[12].mxu1 }
 0x4e0   :  { %v3276_v4 = vpop.f32.mrb[13].mxu1  ;;  %v743_v5 = vsel %vm322_vm6, %v729_v0, -inf  ;;  %v720_v18 = vmul.f32 0.35355338, %v463_v3 }
 0x4e1   :  { %744 = vmax.xlane.f32.xlu0 %v743_v5  ;;  %v466_v6 = vpop.f32.mrb[14].mxu1 }
 0x4e2   :  { %v3277_v7 = vpop.f32.mrb[15].mxu1  ;;  %v728_v28 = vadd.f32 %v720_v18, %v4012_v45 }
 0x4e4   :  { %v740_v34 = vsel %vm322_vm6, %v728_v28, -inf }
 0x4e7   :  { %v562_v8 = vpop.f32.mrb[16].mxu1 }
 0x4e8   :  { %v3288_v11 = vpop.f32.mrb[17].mxu1  ;;  %v722_v39 = vmul.f32 0.35355338, %v562_v8 }
 0x4e9   :  { %v565_v14 = vpop.f32.mrb[18].mxu1 }
 0x4ea   :  { %v3289_v15 = vpop.f32.mrb[19].mxu1  ;;  %v730_v41 = vadd.f32 %v722_v39, %v4026_v17 }
 0x4eb   :  { %v612_v16 = vpop.f32.mrb[8].mxu0 }
 0x4ec   :  { %v723_v19 = vmul.f32 0.35355338, %v612_v16  ;;  %v3294_v20 = vpop.f32.mrb[9].mxu0  ;;  %v746_v42 = vsel %vm322_vm6, %v730_v41, -inf }
 0x4ed   :  { %v615_v21 = vpop.f32.mrb[10].mxu0 }
 0x4ee   :  { %v3295_v22 = vpop.f32.mrb[11].mxu0  ;;  %924 = vrot.lane.b32.xlu1 %v3929_v12, %s4534_s1  ;;  %v4031_v24 = vadd.f32 %v723_v19, %v4026_v17 }
 0x4ef   :  { %v662_v25 = vpop.f32.mrb[20].mxu1 }
 0x4f0   :  { %v3300_v26 = vpop.f32.mrb[21].mxu1  ;;  %v749_v27 = vsel %vm322_vm6, %v4031_v24, -inf  ;;  %v724_v40 = vmul.f32 0.35355338, %v662_v25 }
 0x4f1   :  { %750 = vmax.xlane.f32.xlu0 %v749_v27  ;;  %v665_v29 = vpop.f32.mrb[22].mxu1 }
 0x4f2   :  { %v3301_v30 = vpop.f32.mrb[23].mxu1  ;;  %v732_v43 = vadd.f32 %v724_v40, %v4026_v17 }
 0x4f3   :  { %v712_v31 = vpop.f32.mrb[12].mxu0 }
 0x4f4   :  { %v725_v32 = vmul.f32 0.35355338, %v712_v31  ;;  %v3306_v33 = vpop.f32.mrb[13].mxu0  ;;  %v752_v44 = vsel %vm322_vm6, %v732_v43, -inf }
 0x4f5   :  { %v715_v35 = vpop.f32.mrb[14].mxu0  ;;  %741 = vmax.xlane.f32.xlu0 %v740_v34 }
 0x4f6   :  { %v3307_v36 = vpop.f32.mrb[15].mxu0  ;;  %v4038_v37 = vadd.f32 %v725_v32, %v4026_v17 }
 0x4f8   :  { %v755_v38 = vsel %vm322_vm6, %v4038_v37, -inf }
 0x4f9   :  { %756 = vmax.xlane.f32.xlu0 %v755_v38 }
 0x50f   :  { %876 = vrot.lane.b32.xlu0 %v3929_v12, %s3722_s25 }
 0x512   :  { %747 = vmax.xlane.f32.xlu1 %v746_v42 }
 0x516   :  { %753 = vmax.xlane.f32.xlu1 %v752_v44 }
 0x527   :  { %974 = vrot.lane.b32.xlu1 %v3929_v12, %s4532_s27 }
 0x562   :  { %v736_v46 = vpop.xlane.xlu0 %735 }
 0x563   :  { %v758_v47 = vsub.f32 %v4015_v51, %v736_v46 }
 0x565   :  { %v766_v48 = vmul.f32 1.442695, %v758_v47 }
 0x567   :  { %3622 = vpow2.f32 %v766_v48 }
 0x56a   :  { %v739_v49 = vpop.xlane.xlu1 %738 }
 0x56b   :  { %v759_v50 = vsub.f32 %v4020_v57, %v739_v49 }
 0x56d   :  { %v768_v55 = vmul.f32 1.442695, %v759_v50 }
 0x56e   :  { %v745_v52 = vpop.xlane.xlu0 %744  ;;  %v925_v4 = vpop.permute.xlu1 %924 }
 0x56f   :  { %v761_v53 = vsub.f32 %v729_v0, %v745_v52  ;;  %v930_v39 = vsel %vm106_vm0, %v925_v4, 0 }
 0x571   :  { %v4052_v54 = vpop.eup %3622  ;;  %v772_v23 = vmul.f32 1.442695, %v761_v53 }
 0x572   :  { %v782_v56 = vsel %vm322_vm6, %v4052_v54, 0.0 }
 0x573   :  { %3624 = vpow2.f32 %v772_v23  ;;  %783 = vadd.xlane.f32.xlu1 %v782_v56 }
 0x574   :  { %3626 = vpow2.f32 %v768_v55 }
 0x57d   :  { %v4056_v12 = vpop.eup %3624 }
 0x57e   :  { %v751_v51 = vpop.xlane.xlu0 %750  ;;  %v791_v58 = vsel %vm322_vm6, %v4056_v12, 0.0  ;;  %v3627_v59 = vpop.eup %3626 }
 0x57f   :  { %792 = vadd.xlane.f32.xlu0 %v791_v58  ;;  %v785_v60 = vsel %vm322_vm6, %v3627_v59, 0.0  ;;  %v763_v7 = vsub.f32 %v4031_v24, %v751_v51 }
 0x581   :  { %v776_v15 = vmul.f32 1.442695, %v763_v7 }
 0x582   :  { %v742_v57 = vpop.xlane.xlu0 %741 }
 0x583   :  { %786 = vadd.xlane.f32.xlu0 %v785_v60  ;;  %v760_v0 = vsub.f32 %v728_v28, %v742_v57 }
 0x584   :  { %1089 = vrot.lane.b32.xlu1 %v3936_v13, %s3722_s25 }
 0x585   :  { %v770_v3 = vmul.f32 1.442695, %v760_v0 }
 0x586   :  { %v757_v61 = vpop.xlane.xlu0 %756 }
 0x587   :  { %3628 = vpow2.f32 %v770_v3  ;;  %v765_v16 = vsub.f32 %v4038_v37, %v757_v61 }
 0x589   :  { %v780_v20 = vmul.f32 1.442695, %v765_v16 }
 0x58a   :  { %v877_v62 = vpop.permute.xlu0 %876 }
 0x58b   :  { %v882_v63 = vsel %vm106_vm0, %v877_v62, 0 }
 0x58c   :  { %3315 = vmatpush3.bf16.msra.mxu0 %v882_v63 }
 0x58d   :  { %3326 = vmatprep.subr.bf16.mxu0 %v3711_v9 }
 0x591   :  { %v3629_v11 = vpop.eup %3628 }
 0x592   :  { %v788_v19 = vsel %vm322_vm6, %v3629_v11, 0.0 }
 0x599   :  { %1039 = vrot.lane.b32.xlu0 %v3936_v13, %s4536_s2 }
 0x59f   :  { %v748_v5 = vpop.xlane.xlu1 %747 }
 0x5a0   :  { %v762_v6 = vsub.f32 %v730_v41, %v748_v5 }
 0x5a2   :  { %v774_v8 = vmul.f32 1.442695, %v762_v6 }
 0x5a3   :  { %v754_v10 = vpop.xlane.xlu1 %753 }
 0x5a4   :  { %3630 = vpow2.f32 %v774_v8  ;;  %v764_v14 = vsub.f32 %v732_v43, %v754_v10 }
 0x5a6   :  { %v778_v18 = vmul.f32 1.442695, %v764_v14 }
 0x5a7   :  { %v975_v30 = vpop.permute.xlu1 %974 }
 0x5a8   :  { %3632 = vpow2.f32 %v778_v18  ;;  %789 = vadd.xlane.f32.xlu1 %v788_v19 }
 0x5a9   :  { %3634 = vpow2.f32 %v776_v15 }
 0x5aa   :  { %3636 = vpow2.f32 %v780_v20 }
 0x5ae   :  { %v4070_v21 = vpop.eup %3630 }
 0x5af   :  { %v794_v22 = vsel %vm322_vm6, %v4070_v21, 0.0 }
 0x5b0   :  { %795 = vadd.xlane.f32.xlu1 %v794_v22 }
 0x5b2   :  { %v4074_v24 = vpop.eup %3632 }
 0x5b3   :  { %v800_v25 = vsel %vm322_vm6, %v4074_v24, 0.0  ;;  %v4078_v26 = vpop.eup %3634 }
 0x5b4   :  { %801 = vadd.xlane.f32.xlu1 %v800_v25  ;;  %v797_v27 = vsel %vm322_vm6, %v4078_v26, 0.0  ;;  %v4082_v28 = vpop.eup %3636 }
 0x5b5   :  { %v803_v29 = vsel %vm322_vm6, %v4082_v28, 0.0 }
 0x5b8   :  { %798 = vadd.xlane.f32.xlu0 %v797_v27 }
 0x5bc   :  { %804 = vadd.xlane.f32.xlu0 %v803_v29 }
 0x5c5   :  { %1187 = vrot.lane.b32.xlu1 %v3936_v13, %s4532_s27 }
 0x5d2   :  { %1137 = vrot.lane.b32.xlu0 %v3936_v13, %s4534_s1  ;;  %v980_v13 = vsel %vm106_vm0, %v975_v30, 0  ;;  %v3598_v30 = vld [vmem:[%s4513_s9] sm:$0xff]  }
 0x600   :  { %v784_v31 = vpop.xlane.xlu1 %783 }
 0x601   :  { %3638 = vrcp.f32 %v784_v31 }
 0x604   :  { %v1090_v41 = vpop.permute.xlu1 %1089 }
 0x605   :  { %v1095_v23 = vsel %vm106_vm0, %v1090_v41, 0 }
 0x60b   :  { %v3639_v34 = vpop.eup %3638 }
 0x60c   :  { %v793_v32 = vpop.xlane.xlu0 %792  ;;  %v814_v36 = vmul.f32 %v3639_v34, %v4052_v54 }
 0x610   :  { %v787_v33 = vpop.xlane.xlu0 %786 }
 0x611   :  { %3640 = vrcp.f32 %v787_v33  ;;  %v3599_v33 = vld [vmem:[%s4513_s9 + $0x8] sm:$0xff]  }
 0x612   :  { %3642 = vrcp.f32 %v793_v32 }
 0x614   :  { %v1040_v48 = vpop.permute.xlu0 %1039 }
 0x615   :  { %v1045_v52 = vsel %vm106_vm0, %v1040_v48, 0 }
 0x61b   :  { %v3641_v35 = vpop.eup %3640 }
 0x61c   :  { %v815_v37 = vmul.f32 %v3641_v35, %v3627_v59  ;;  %v3643_v43 = vpop.eup %3642 }
 0x61d   :  { %v817_v47 = vmul.f32 %v3643_v43, %v4056_v12 }
 0x61e   :  { %v822_v38 = vpack.c.bf16 %v815_v37, %v814_v36 }
 0x620   :  { %3311 = vmatmul.mubr.msk.bf16.vlgmr.msra.gmra.mrb[24].mxu1 %vm322_vm6, %v822_v38  ;;  %v875_v40 = vrot.slane %v822_v38, 4 }
 0x621   :  { %3321 = vmatpush3.bf16.msra.mxu1 %v930_v39  ;;  %3322 = vmatprep.mubr.msk.bf16.mxu1 %vm3712_vm5, %v3711_v9 }
 0x622   :  { %3317 = vmatmul.mubr.msk.bf16.vlgmr.msra.gmra.mrb[16].mxu0 %vm322_vm6, %v875_v40  ;;  %3332 = vmatprep.subr.bf16.mxu1 %v3711_v9 }
 0x623   :  { %3327 = vmatpush3.bf16.msra.mxu0 %v980_v13  ;;  %3328 = vmatprep.mubr.msk.bf16.mxu0 %vm3712_vm5, %v3711_v9 }
 0x624   :  { %3338 = vmatprep.subr.bf16.mxu0 %v3711_v9 }
 0x635   :  { %v790_v42 = vpop.xlane.xlu1 %789 }
 0x636   :  { %3644 = vrcp.f32 %v790_v42 }
 0x63d   :  { %v796_v46 = vpop.xlane.xlu1 %795 }
 0x63e   :  { %3646 = vrcp.f32 %v796_v46 }
 0x640   :  { %v3645_v44 = vpop.eup %3644 }
 0x641   :  { %v816_v49 = vmul.f32 %v3645_v44, %v3629_v11  ;;  %v802_v55 = vpop.xlane.xlu1 %801 }
 0x643   :  { %v823_v50 = vpack.c.bf16 %v817_v47, %v816_v49 }
 0x645   :  { %v799_v53 = vpop.xlane.xlu0 %798  ;;  %3323 = vmatmul.mubr.msk.bf16.vlgmr.msra.gmra.mrb[28].mxu1 %vm322_vm6, %v823_v50  ;;  %v973_v54 = vrot.slane %v823_v50, 4  ;;  %v1188_v63 = vpop.permute.xlu1 %1187 }
 0x646   :  { %3648 = vrcp.f32 %v799_v53  ;;  %3333 = vmatpush3.bf16.msra.mxu1 %v1045_v52  ;;  %3334 = vmatprep.mubr.msk.bf16.mxu1 %vm3712_vm5, %v3711_v9  ;;  %v1193_v6 = vsel %vm106_vm0, %v1188_v63, 0 }
 0x647   :  { %3329 = vmatmul.mubr.msk.bf16.vlgmr.msra.gmra.mrb[20].mxu0 %vm322_vm6, %v973_v54  ;;  %3344 = vmatprep.subr.bf16.mxu1 %v3711_v9  ;;  %3650 = vrcp.f32 %v802_v55 }
 0x648   :  { %3339 = vmatpush3.bf16.msra.mxu0 %v1095_v23  ;;  %3340 = vmatprep.mubr.msk.bf16.mxu0 %vm3712_vm5, %v3711_v9  ;;  %v3647_v12 = vpop.eup %3646 }
 0x649   :  { %v805_v56 = vpop.xlane.xlu0 %804  ;;  %3350 = vmatprep.subr.bf16.mxu0 %v3711_v9  ;;  %v818_v58 = vmul.f32 %v3647_v12, %v4070_v21 }
 0x64a   :  { %3652 = vrcp.f32 %v805_v56 }
 0x64d   :  { %v1138_v57 = vpop.permute.xlu0 %1137 }
 0x64e   :  { %v1143_v3 = vsel %vm106_vm0, %v1138_v57, 0 }
 0x650   :  { %v3649_v51 = vpop.eup %3648 }
 0x651   :  { %v819_v59 = vmul.f32 %v3649_v51, %v4078_v26  ;;  %v3651_v60 = vpop.eup %3650 }
 0x652   :  { %v820_v5 = vmul.f32 %v3651_v60, %v4074_v24 }
 0x653   :  { %v824_v61 = vpack.c.bf16 %v819_v59, %v818_v58 }
 0x654   :  { %v3653_v62 = vpop.eup %3652 }
 0x655   :  { %v821_v0 = vmul.f32 %v3653_v62, %v4082_v28  ;;  %3335 = vmatmul.mubr.msk.bf16.vlgmr.msra.gmra.mrb[32].mxu1 %vm322_vm6, %v824_v61  ;;  %v1088_v4 = vrot.slane %v824_v61, 4 }
 0x656   :  { %3345 = vmatpush3.bf16.msra.mxu1 %v1143_v3  ;;  %3346 = vmatprep.mubr.msk.bf16.mxu1 %vm3712_vm5, %v3711_v9  ;;  %v3025_v3 = vld [vmem:[%s4514_s10] ss:$0 sm:$0xff] }
 0x657   :  { %3341 = vmatmul.mubr.msk.bf16.vlgmr.msra.gmra.mrb[24].mxu0 %vm322_vm6, %v1088_v4  ;;  %3356 = vmatprep.subr.bf16.mxu1 %v3711_v9  ;;  %v825_v7 = vpack.c.bf16 %v821_v0, %v820_v5 }
 0x658   :  { %3351 = vmatpush3.bf16.msra.mxu0 %v1193_v6  ;;  %3352 = vmatprep.mubr.msk.bf16.mxu0 %vm3712_vm5, %v3711_v9 }
 0x659   :  { %3364 = vmatprep.subr.bf16.mxu0 %v3711_v9  ;;  %v1186_v8 = vrot.slane %v825_v7, 4 }
 0x65d   :  { %3347 = vmatmul.mubr.msk.bf16.vlgmr.msra.gmra.mrb[36].mxu1 %vm322_vm6, %v825_v7 }
 0x65e   :  { %3360 = vmatprep.mubr.msk.bf16.mxu1 %vm3712_vm5, %v3711_v9  ;;  %3357 = vmatpush3.bf16.msra.mxu1 %v3598_v30 }
 0x65f   :  { %3353 = vmatmul.mubr.msk.bf16.vlgmr.msra.gmra.mrb[28].mxu0 %vm322_vm6, %v1186_v8  ;;  %3358 = vmatprep.subr.bf16.mxu1 %v3711_v9 }
 0x660   :  { %3368 = vmatprep.mubr.msk.bf16.mxu0 %vm3712_vm5, %v3711_v9 }
 0x662   :  { %3359 = vmatpush3.bf16.msra.mxu1 %v3599_v33 }
 0x663   :  { %3372 = vmatprep.subr.bf16.mxu1 %v3711_v9 }
 0x6f3   :  { %v868_v10 = vpop.f32.mrb[24].mxu1 }
 0x6f4   :  { %v3312_v11 = vpop.f32.mrb[25].mxu1 }
 0x6f5   :  { %v871_v14 = vpop.f32.mrb[26].mxu1  ;;  %v918_v15 = vpop.f32.mrb[16].mxu0 }
 0x6f6   :  { %v3313_v16 = vpop.f32.mrb[27].mxu1  ;;  %v3318_v18 = vpop.f32.mrb[17].mxu0 }
 0x6f7   :  { %v921_v19 = vpop.f32.mrb[18].mxu0 }
 0x6f8   :  { %v3319_v20 = vpop.f32.mrb[19].mxu0 }
 0x718   :  { %v966_v21 = vpop.f32.mrb[28].mxu1 }
 0x719   :  { %v3324_v22 = vpop.f32.mrb[29].mxu1 }
 0x71a   :  { %v969_v24 = vpop.f32.mrb[30].mxu1  ;;  %v1016_v25 = vpop.f32.mrb[20].mxu0 }
 0x71b   :  { %v3325_v26 = vpop.f32.mrb[31].mxu1  ;;  %v3330_v27 = vpop.f32.mrb[21].mxu0 }
 0x71c   :  { %v1019_v28 = vpop.f32.mrb[22].mxu0 }
 0x71d   :  { %v3331_v29 = vpop.f32.mrb[23].mxu0  ;;  %v3601_v28 = vld [vmem:[%s4515_s13 + $0x8] sm:$0xff]  }
 0x728   :  { %v1081_v31 = vpop.f32.mrb[32].mxu1 }
 0x729   :  { %v3336_v32 = vpop.f32.mrb[33].mxu1 }
 0x72a   :  { %v1084_v34 = vpop.f32.mrb[34].mxu1  ;;  %v1131_v35 = vpop.f32.mrb[24].mxu0 }
 0x72b   :  { %v3566_v36 = vpack.i.bf16 %v1131_v35, %v918_v15  ;;  %v3337_v37 = vpop.f32.mrb[35].mxu1  ;;  %v3342_v38 = vpop.f32.mrb[25].mxu0 }
 0x72c   :  { %v1134_v39 = vpop.f32.mrb[26].mxu0 }
 0x72d   :  { %3567 = vrot.lane.b32.xlu0 %v3566_v36, %s4531_s3  ;;  %v3343_v40 = vpop.f32.mrb[27].mxu0  ;;  %v3029_v36 = vld [vmem:[%s4516_s11] ss:$0 sm:$0xff] }
 0x730   :  { %v1179_v13 = vpop.f32.mrb[36].mxu1 }
 0x731   :  { %v3571_v41 = vpack.i.bf16 %v1179_v13, %v966_v21  ;;  %v3348_v42 = vpop.f32.mrb[37].mxu1  ;;  %v3030_v13 = vld [vmem:[%s4517_s12] ss:$0 sm:$0xff] }
 0x732   :  { %v1182_v43 = vpop.f32.mrb[38].mxu1  ;;  %v1229_v44 = vpop.f32.mrb[28].mxu0 }
 0x733   :  { %v3576_v46 = vpack.i.bf16 %v1229_v44, %v1016_v25  ;;  %v3354_v47 = vpop.f32.mrb[29].mxu0  ;;  %3572 = vrot.lane.b32.xlu1 %v3571_v41, %s4530_s28  ;;  %v3349_v48 = vpop.f32.mrb[39].mxu1 }
 0x734   :  { %v1232_v49 = vpop.f32.mrb[30].mxu0  ;;  %v3603_v47 = vld [vmem:[%s4518_s15 + $0x8] sm:$0xff]   ;;  %v3604_v48 = vld [vmem:[%s4518_s15 + $0x10] sm:$0xff]  }
 0x735   :  { %3577 = vrot.lane.b32.xlu0 %v3576_v46, %s4529_s4  ;;  %v3355_v50 = vpop.f32.mrb[31].mxu0  ;;  %v3602_v46 = vld [vmem:[%s4518_s15] sm:$0xff]   ;;  %v3605_v49 = vld [vmem:[%s4518_s15 + $0x18] sm:$0xff]  }
 0x736   :  { %v3031_v50 = vld [vmem:[%s4519_s14] ss:$0 sm:$0xff] }
 0x79f   :  { %v3568_v52 = vpop.permute.xlu0 %3567 }
 0x7a0   :  { %v3570_v53 = vunpack.i.h.bf16 %v3568_v52  ;;  %v3569_v54 = vunpack.i.l.bf16 %v3568_v52 }
 0x7a2   :  { %v1034_v12 = vsel %vm322_vm6, %v868_v10, %v3569_v54  ;;  %v1247_v51 = vsel %vm322_vm6, %v1081_v31, %v3570_v53 }
 0x7a5   :  { %v3573_v55 = vpop.permute.xlu1 %3572 }
 0x7a6   :  { %v3575_v23 = vunpack.i.h.bf16 %v3573_v55  ;;  %v3574_v56 = vunpack.i.l.bf16 %v3573_v55 }
 0x7a7   :  { %v3578_v58 = vpop.permute.xlu0 %3577 }
 0x7a8   :  { %v1248_v59 = vsel %vm1035_vm7, %v1247_v51, %v3575_v23  ;;  %v1036_v57 = vsel %vm1035_vm7, %v1034_v12, %v3574_v56  ;;  %v3580_v60 = vunpack.i.h.bf16 %v3578_v58  ;;  %v3579_v61 = vunpack.i.l.bf16 %v3578_v58 }
 0x7aa   :  { %v1038_v62 = vsel %vm1037_vm8, %v1036_v57, %v3579_v61  ;;  %v1249_v63 = vsel %vm1037_vm8, %v1248_v59, %v3580_v60 }
 0x7ab   :  { %v1250_v0 = vpack.c.bf16 %v1249_v63, %v1038_v62 }
 0x7ad   :  { %3361 = vmatmul.mubr.msk.bf16.vlgmr.msra.gmra.mrb[40].mxu1 %vm194_vm4, %v1250_v0 }
 0x7ae   :  { %3380 = vmatprep.mubr.msk.bf16.mxu1 %vm3712_vm5, %v3711_v9  ;;  %3373 = vmatpush3.bf16.msra.mxu1 %v3602_v46 }
 0x7af   :  { %3374 = vmatprep.subr.bf16.mxu1 %v3711_v9 }
 0x7b2   :  { %3375 = vmatpush3.bf16.msra.mxu1 %v3603_v47 }
 0x7b3   :  { %3376 = vmatprep.subr.bf16.mxu1 %v3711_v9 }
 0x7b6   :  { %3377 = vmatpush3.bf16.msra.mxu1 %v3604_v48 }
 0x7b7   :  { %3378 = vmatprep.subr.bf16.mxu1 %v3711_v9 }
 0x7ba   :  { %3379 = vmatpush3.bf16.msra.mxu1 %v3605_v49 }
 0x7bb   :  { %3398 = vmatprep.subr.bf16.mxu1 %v3711_v9 }
 0x880   :  { %v1311_v4 = vpop.f32.mrb[40].mxu1 }
 0x881   :  { %v1312_v5 = vadd.f32 %v3025_v3, %v1311_v4  ;;  %v3362_v6 = vpop.f32.mrb[41].mxu1 }
 0x882   :  { %v1314_v7 = vpop.f32.mrb[42].mxu1 }
 0x883   :  { %v1315_v8 = vadd.f32 %v3025_v3, %v1314_v7  ;;  %v3363_v10 = vpop.f32.mrb[43].mxu1  ;;  %v1318_v11 = vadd.f32 %v1312_v5, %v3917_v1 }
 0x885   :  { %v1322_v14 = vsel %vm194_vm4, %v1318_v11, 0.0  ;;  %v1319_v15 = vadd.f32 %v1315_v8, %v3919_v2  ;;  %v3600_v2 = vld [vmem:[%s4515_s13] sm:$0xff]  }
 0x886   :  { %1323 = vadd.xlane.f32.xlu1 %v1322_v14  ;;  %3365 = vmatpush3.bf16.msra.mxu0 %v3600_v2 }
 0x887   :  { %v1325_v16 = vsel %vm194_vm4, %v1319_v15, 0.0  ;;  %3366 = vmatprep.subr.bf16.mxu0 %v3711_v9 }
 0x888   :  { %1326 = vadd.xlane.f32.xlu0 %v1325_v16 }
 0x88a   :  { %3367 = vmatpush3.bf16.msra.mxu0 %v3601_v28 }
 0x88b   :  { %3384 = vmatprep.subr.bf16.mxu0 %v3711_v9 }
 0x913   :  { %v1324_v18 = vpop.xlane.xlu1 %1323 }
 0x914   :  { %v1328_v19 = vmul.f32 0.03125, %v1324_v18 }
 0x915   :  { %v1327_v20 = vpop.xlane.xlu0 %1326 }
 0x916   :  { %v1330_v21 = vsub.f32 %v1318_v11, %v1328_v19  ;;  %v1329_v22 = vmul.f32 0.03125, %v1327_v20 }
 0x918   :  { %v1331_v24 = vsub.f32 %v1319_v15, %v1329_v22  ;;  %v1332_v25 = vmul.f32 %v1330_v21, %v1330_v21  ;;  %v3035_v15 = vld [vmem:[%s4520_s16] ss:$0 sm:$0xff] }
 0x91a   :  { %v1334_v26 = vsel %vm194_vm4, %v1332_v25, 0.0  ;;  %v1333_v27 = vmul.f32 %v1331_v24, %v1331_v24 }
 0x91b   :  { %1335 = vadd.xlane.f32.xlu0 %v1334_v26 }
 0x91c   :  { %v1337_v1 = vsel %vm194_vm4, %v1333_v27, 0.0 }
 0x91d   :  { %1338 = vadd.xlane.f32.xlu1 %v1337_v1 }
 0x9a8   :  { %v1336_v29 = vpop.xlane.xlu0 %1335 }
 0x9a9   :  { %v1340_v30 = vmul.f32 0.03125, %v1336_v29 }
 0x9aa   :  { %v1339_v31 = vpop.xlane.xlu1 %1338 }
 0x9ab   :  { %v1342_v32 = vadd.f32 1e-12, %v1340_v30  ;;  %v1341_v33 = vmul.f32 0.03125, %v1339_v31 }
 0x9ad   :  { %3654 = vrsqrt.f32 %v1342_v32  ;;  %v1343_v34 = vadd.f32 1e-12, %v1341_v33 }
 0x9af   :  { %3656 = vrsqrt.f32 %v1343_v34 }
 0x9b7   :  { %v3655_v35 = vpop.eup %3654 }
 0x9b8   :  { %v1346_v37 = vmul.f32 %v3655_v35, %v1330_v21 }
 0x9b9   :  { %v3657_v38 = vpop.eup %3656 }
 0x9ba   :  { %v1354_v39 = vmul.f32 %v3029_v36, %v1346_v37  ;;  %v1347_v40 = vmul.f32 %v3657_v38, %v1331_v24  ;;  %v3607_v37 = vld [vmem:[%s4548_s22 + $0x18] sm:$0xff]  }
 0x9bc   :  { %v1355_v41 = vmul.f32 %v3029_v36, %v1347_v40  ;;  %v1362_v42 = vadd.f32 %v3030_v13, %v1354_v39  ;;  %v3606_v36 = vld [vmem:[%s4548_s22 + $0x10] sm:$0xff]  }
 0x9be   :  { %v1363_v43 = vadd.f32 %v3030_v13, %v1355_v41 }
 0x9c0   :  { %v1364_v44 = vpack.c.bf16 %v1363_v43, %v1362_v42 }
 0x9c2   :  { %3369 = vmatmul.mubr.msk.bf16.vlgmr.msra.gmra.mrb[32].mxu0 %vm194_vm4, %v1364_v44  ;;  %v3041_v44 = vld [vmem:[%s4521_s17] ss:$0 sm:$0xff] }
 0x9c3   :  { %3388 = vmatprep.mubr.msk.bf16.mxu0 %vm3712_vm5, %v3711_v9  ;;  %3385 = vmatpush3.bf16.msra.mxu0 %v3606_v36 }
 0x9c4   :  { %3386 = vmatprep.subr.bf16.mxu0 %v3711_v9 }
 0x9c7   :  { %3387 = vmatpush3.bf16.msra.mxu0 %v3607_v37 }
 0x9c8   :  { %3392 = vmatprep.subr.bf16.mxu0 %v3711_v9 }
 0xa95   :  { %v1425_v52 = vpop.f32.mrb[32].mxu0 }
 0xa96   :  { %v1426_v53 = vadd.f32 %v3031_v50, %v1425_v52  ;;  %v3370_v54 = vpop.f32.mrb[33].mxu0 }
 0xa97   :  { %v1428_v55 = vpop.f32.mrb[34].mxu0 }
 0xa98   :  { %v1434_v23 = vmul.f32 0.044715, %v1426_v53  ;;  %v1429_v56 = vadd.f32 %v3031_v50, %v1428_v55  ;;  %v3371_v12 = vpop.f32.mrb[35].mxu0  ;;  %v1432_v6 = vmul.f32 0.5, %v1426_v53  ;;  %v3042_v50 = vld [vmem:[%s4522_s18] ss:$0 sm:$0xff] }
 0xa9a   :  { %v1436_v51 = vmul.f32 %v1434_v23, %v1426_v53  ;;  %v1435_v58 = vmul.f32 0.044715, %v1429_v56  ;;  %v1433_v7 = vmul.f32 0.5, %v1429_v56  ;;  %v3048_v23 = vld [vmem:[%s4511_s8 + $0x1] ss:$0 sm:$0xff]  ;;  %s4550_s8 = smov 64  }
 0xa9c   :  { %v1438_v59 = vmul.f32 %v1436_v51, %v1426_v53  ;;  %v1437_v57 = vmul.f32 %v1435_v58, %v1429_v56 }
 0xa9e   :  { %v1440_v60 = vadd.f32 %v1438_v59, %v1426_v53  ;;  %v1439_v61 = vmul.f32 %v1437_v57, %v1429_v56 }
 0xaa0   :  { %v1442_v62 = vmul.f32 0.7978846, %v1440_v60  ;;  %v1441_v63 = vadd.f32 %v1439_v61, %v1429_v56 }
 0xaa2   :  { %3658 = vtanh.f32 %v1442_v62  ;;  %v1443_v0 = vmul.f32 0.7978846, %v1441_v63 }
 0xaa4   :  { %3660 = vtanh.f32 %v1443_v0 }
 0xaac   :  { %v3659_v3 = vpop.eup %3658 }
 0xaad   :  { %v1446_v4 = vadd.f32 1.0, %v3659_v3 }
 0xaae   :  { %v3661_v5 = vpop.eup %3660 }
 0xaaf   :  { %v1447_v8 = vadd.f32 1.0, %v3661_v5  ;;  %v1448_v10 = vmul.f32 %v1446_v4, %v1432_v6 }
 0xab1   :  { %v1449_v11 = vmul.f32 %v1447_v8, %v1433_v7 }
 0xab3   :  { %v1450_v14 = vpack.c.bf16 %v1449_v11, %v1448_v10 }
 0xab5   :  { %3381 = vmatmul.mubr.msk.bf16.vlgmr.msra.gmra.mrb[44].mxu1 %vm1490_vm9, %v1450_v14 }
 0xab6   :  { %3400 = vmatprep.mubr.msk.bf16.mxu1 %vm3712_vm5, %v3711_v9 }
 0xb88   :  { %v1528_v16 = vpop.f32.mrb[44].mxu1 }
 0xb89   :  { %v1529_v18 = vadd.f32 %v3035_v15, %v1528_v16  ;;  %v3382_v19 = vpop.f32.mrb[45].mxu1 }
 0xb8a   :  { %v1531_v20 = vpop.f32.mrb[46].mxu1 }
 0xb8b   :  { %v1532_v21 = vadd.f32 %v3035_v15, %v1531_v20  ;;  %v3383_v22 = vpop.f32.mrb[47].mxu1  ;;  %v1535_v24 = vadd.f32 %v1529_v18, %v1362_v42 }
 0xb8d   :  { %v1539_v25 = vsel %vm194_vm4, %v1535_v24, 0.0  ;;  %v1536_v26 = vadd.f32 %v1532_v21, %v1363_v43 }
 0xb8e   :  { %1540 = vadd.xlane.f32.xlu0 %v1539_v25 }
 0xb8f   :  { %v1542_v27 = vsel %vm194_vm4, %v1536_v26, 0.0 }
 0xb90   :  { %1543 = vadd.xlane.f32.xlu1 %v1542_v27 }
 0xc1b   :  { %v1541_v1 = vpop.xlane.xlu0 %1540 }
 0xc1c   :  { %v1545_v2 = vmul.f32 0.03125, %v1541_v1 }
 0xc1d   :  { %v1544_v28 = vpop.xlane.xlu1 %1543 }
 0xc1e   :  { %v1547_v29 = vsub.f32 %v1535_v24, %v1545_v2  ;;  %v1546_v30 = vmul.f32 0.03125, %v1544_v28 }
 0xc20   :  { %v1548_v31 = vsub.f32 %v1536_v26, %v1546_v30  ;;  %v1549_v32 = vmul.f32 %v1547_v29, %v1547_v29 }
 0xc22   :  { %v1551_v33 = vsel %vm194_vm4, %v1549_v32, 0.0  ;;  %v1550_v34 = vmul.f32 %v1548_v31, %v1548_v31 }
 0xc23   :  { %1552 = vadd.xlane.f32.xlu0 %v1551_v33 }
 0xc24   :  { %v1554_v35 = vsel %vm194_vm4, %v1550_v34, 0.0 }
 0xc25   :  { %1555 = vadd.xlane.f32.xlu1 %v1554_v35 }
 0xcb0   :  { %v1553_v38 = vpop.xlane.xlu0 %1552 }
 0xcb1   :  { %v1557_v39 = vmul.f32 0.03125, %v1553_v38 }
 0xcb2   :  { %v1556_v40 = vpop.xlane.xlu1 %1555 }
 0xcb3   :  { %v1559_v13 = vadd.f32 1e-12, %v1557_v39  ;;  %v1558_v41 = vmul.f32 0.03125, %v1556_v40 }
 0xcb5   :  { %3662 = vrsqrt.f32 %v1559_v13  ;;  %v1560_v42 = vadd.f32 1e-12, %v1558_v41 }
 0xcb7   :  { %3664 = vrsqrt.f32 %v1560_v42 }
 0xcbf   :  { %v3663_v43 = vpop.eup %3662 }
 0xcc0   :  { %v1563_v46 = vmul.f32 %v3663_v43, %v1547_v29 }
 0xcc1   :  { %v3665_v47 = vpop.eup %3664 }
 0xcc2   :  { %v1571_v48 = vmul.f32 %v3041_v44, %v1563_v46  ;;  %v1564_v49 = vmul.f32 %v3665_v47, %v1548_v31 }
 0xcc4   :  { %v1572_v52 = vmul.f32 %v3041_v44, %v1564_v49  ;;  %v4221_v53 = vadd.f32 %v3042_v50, %v1571_v48 }
 0xcc6   :  { %v4223_v54 = vadd.f32 %v3042_v50, %v1572_v52 }
 0xcc8   :  { %v1581_v55 = vpack.c.bf16 %v4223_v54, %v4221_v53 }
 0xcca   :  { %3389 = vmatmul.mubr.msk.bf16.vlgmr.msra.gmra.mrb[36].mxu0 %vm194_vm4, %v1581_v55 }
 0xccb   :  { %3394 = vmatprep.mubr.msk.bf16.mxu0 %vm3712_vm5, %v3711_v9 }
 0xd9d   :  { %v1644_v56 = vpop.f32.mrb[36].mxu0 }
 0xd9e   :  { %v3390_v12 = vpop.f32.mrb[37].mxu0  ;;  %v1645_v58 = vadd.f32 %v3048_v23, %v1644_v56 }
 0xd9f   :  { %v1647_v51 = vpop.f32.mrb[38].mxu0 }
 0xda0   :  { %v1648_v59 = vadd.f32 %v3048_v23, %v1647_v51  ;;  %v3391_v57 = vpop.f32.mrb[39].mxu0 }
 0xda2   :  { %v4233_v60 = vpack.c.bf16 %v1648_v59, %v1645_v58 }
 0xda4   :  { %1703 = vrot.lane.b32.xlu1 %v4233_v60, %s3715_s0  ;;  %1653 = vrot.lane.b32.xlu0 %v4233_v60, %s3714_s29  ;;  %v4248_v61 = vrot.slane %v4233_v60, 4 }
 0xda8   :  { %1701 = vrot.lane.b32.xlu1 %v4233_v60, %s3717_s30  ;;  %1753 = vrot.lane.b32.xlu0 %v4233_v60, %s3716_s7 }
 0xdac   :  { %1803 = vrot.lane.b32.xlu1 %v4233_v60, %s3713_s6  ;;  %1751 = vrot.lane.b32.xlu0 %v4233_v60, %s3718_s5 }
 0xdb0   :  { %1801 = vrot.lane.b32.xlu1 %v4233_v60, %s3719_s23  ;;  %1852 = vrot.lane.b32.xlu0 %v4248_v61, %s3714_s29  ;;  %s4552_s29 = smov 40  }
 0xdb4   :  { %1902 = vrot.lane.b32.xlu1 %v4248_v61, %s3715_s0  ;;  %1900 = vrot.lane.b32.xlu0 %v4248_v61, %s3717_s30 }
 0xdb8   :  { %1952 = vrot.lane.b32.xlu1 %v4248_v61, %s3716_s7  ;;  %2002 = vrot.lane.b32.xlu0 %v4248_v61, %s3713_s6  ;;  %s4551_s6 = smov 48  }
 0xdbc   :  { %1950 = vrot.lane.b32.xlu1 %v4248_v61, %s3718_s5  ;;  %2000 = vrot.lane.b32.xlu0 %v4248_v61, %s3719_s23  ;;  %s4553_s23 = smov 8  }
 0xdc0   :  { %2208 = vrot.lane.b32.xlu1 %v4233_v60, %s3722_s25  ;;  %2158 = vrot.lane.b32.xlu0 %v4233_v60, %s4550_s8 }
 0xe16   :  { %v1704_v62 = vpop.permute.xlu1 %1703  ;;  %v1654_v63 = vpop.permute.xlu0 %1653 }
 0xe17   :  { %v1709_v0 = vsel %vm322_vm6, %v1704_v62, 0  ;;  %v1659_v3 = vsel %vm322_vm6, %v1654_v63, 0 }
 0xe18   :  { %3393 = vmatpush3.bf16.xpose.msra.mxu0 %v1659_v3  ;;  %3399 = vmatpush3.bf16.xpose.msra.mxu1 %v1709_v0 }
 0xe19   :  { %3404 = vmatprep.subr.bf16.mxu0 %v3711_v9  ;;  %3410 = vmatprep.subr.bf16.mxu1 %v3711_v9 }
 0xe1a   :  { %v1702_v4 = vpop.permute.xlu1 %1701  ;;  %v1754_v5 = vpop.permute.xlu0 %1753 }
 0xe1b   :  { %v1759_v8 = vsel %vm322_vm6, %v1754_v5, 0 }
 0xe1e   :  { %v1804_v6 = vpop.permute.xlu1 %1803  ;;  %v1752_v7 = vpop.permute.xlu0 %1751 }
 0xe1f   :  { %v1809_v10 = vsel %vm322_vm6, %v1804_v6, 0  ;;  %3395 = vmatmul.mubr.msk.bf16.vlgmr.msra.gmra.mrb[40].mxu0 %vm322_vm6, %v4233_v60  ;;  %3401 = vmatmul.mubr.msk.bf16.vlgmr.msra.gmra.mrb[48].mxu1 %vm322_vm6, %v1702_v4 }
 0xe20   :  { %3405 = vmatpush3.bf16.xpose.msra.mxu0 %v1759_v8  ;;  %3411 = vmatpush3.bf16.xpose.msra.mxu1 %v1809_v10 }
 0xe21   :  { %3406 = vmatprep.mubr.msk.bf16.mxu0 %vm3712_vm5, %v3711_v9  ;;  %3412 = vmatprep.mubr.msk.bf16.mxu1 %vm3712_vm5, %v3711_v9 }
 0xe22   :  { %v1802_v11 = vpop.permute.xlu1 %1801  ;;  %v1853_v14 = vpop.permute.xlu0 %1852  ;;  %3416 = vmatprep.subr.bf16.mxu0 %v3711_v9  ;;  %3422 = vmatprep.subr.bf16.mxu1 %v3711_v9 }
 0xe23   :  { %v1858_v18 = vsel %vm322_vm6, %v1853_v14, 0 }
 0xe26   :  { %v1903_v15 = vpop.permute.xlu1 %1902  ;;  %v1901_v16 = vpop.permute.xlu0 %1900 }
 0xe27   :  { %v1908_v19 = vsel %vm322_vm6, %v1903_v15, 0  ;;  %3407 = vmatmul.mubr.msk.bf16.vlgmr.msra.gmra.mrb[44].mxu0 %vm322_vm6, %v1752_v7  ;;  %3413 = vmatmul.mubr.msk.bf16.vlgmr.msra.gmra.mrb[52].mxu1 %vm322_vm6, %v1802_v11 }
 0xe28   :  { %3417 = vmatpush3.bf16.xpose.msra.mxu0 %v1858_v18  ;;  %3423 = vmatpush3.bf16.xpose.msra.mxu1 %v1908_v19 }
 0xe29   :  { %3418 = vmatprep.mubr.msk.bf16.mxu0 %vm3712_vm5, %v3711_v9  ;;  %3424 = vmatprep.mubr.msk.bf16.mxu1 %vm3712_vm5, %v3711_v9 }
 0xe2a   :  { %v1953_v20 = vpop.permute.xlu1 %1952  ;;  %v2003_v21 = vpop.permute.xlu0 %2002  ;;  %3428 = vmatprep.subr.bf16.mxu0 %v3711_v9  ;;  %3434 = vmatprep.subr.bf16.mxu1 %v3711_v9 }
 0xe2b   :  { %v1958_v25 = vsel %vm322_vm6, %v1953_v20, 0  ;;  %v2008_v26 = vsel %vm322_vm6, %v2003_v21, 0 }
 0xe2e   :  { %v1951_v22 = vpop.permute.xlu1 %1950  ;;  %v2001_v24 = vpop.permute.xlu0 %2000 }
 0xe2f   :  { %3419 = vmatmul.mubr.msk.bf16.vlgmr.msra.gmra.mrb[48].mxu0 %vm322_vm6, %v4248_v61  ;;  %3425 = vmatmul.mubr.msk.bf16.vlgmr.msra.gmra.mrb[56].mxu1 %vm322_vm6, %v1901_v16 }
 0xe30   :  { %3429 = vmatpush3.bf16.xpose.msra.mxu0 %v1958_v25  ;;  %3435 = vmatpush3.bf16.xpose.msra.mxu1 %v2008_v26 }
 0xe31   :  { %3430 = vmatprep.mubr.msk.bf16.mxu0 %vm3712_vm5, %v3711_v9  ;;  %3436 = vmatprep.mubr.msk.bf16.mxu1 %vm3712_vm5, %v3711_v9 }
 0xe32   :  { %3440 = vmatprep.subr.bf16.mxu0 %v3711_v9  ;;  %3446 = vmatprep.subr.bf16.mxu1 %v3711_v9  ;;  %v2209_v27 = vpop.permute.xlu1 %2208  ;;  %v2159_v1 = vpop.permute.xlu0 %2158 }
 0xe33   :  { %v2214_v2 = vsel %vm106_vm0, %v2209_v27, 0  ;;  %v2164_v28 = vsel %vm106_vm0, %v2159_v1, 0 }
 0xe37   :  { %3431 = vmatmul.mubr.msk.bf16.vlgmr.msra.gmra.mrb[52].mxu0 %vm322_vm6, %v1951_v22  ;;  %3437 = vmatmul.mubr.msk.bf16.vlgmr.msra.gmra.mrb[60].mxu1 %vm322_vm6, %v2001_v24 }
 0xe38   :  { %3441 = vmatpush3.bf16.msra.mxu0 %v2164_v28  ;;  %3447 = vmatpush3.bf16.msra.mxu1 %v2214_v2 }
 0xe39   :  { %3442 = vmatprep.mubr.msk.bf16.mxu0 %vm3712_vm5, %v3711_v9  ;;  %3452 = vmatprep.subr.bf16.mxu0 %v3711_v9 }
 0xe3a   :  { %3448 = vmatprep.mubr.msk.bf16.mxu1 %vm3712_vm5, %v3711_v9  ;;  %3458 = vmatprep.subr.bf16.mxu1 %v3711_v9 }
 0xef2   :  { %v1695_v29 = vpop.f32.mrb[40].mxu0  ;;  %v1745_v30 = vpop.f32.mrb[48].mxu1 }
 0xef3   :  { %v2050_v31 = vmul.f32 0.35355338, %v1695_v29  ;;  %v2051_v32 = vmul.f32 0.35355338, %v1745_v30  ;;  %v3396_v33 = vpop.f32.mrb[41].mxu0  ;;  %v3402_v34 = vpop.f32.mrb[49].mxu1 }
 0xef4   :  { %v1698_v35 = vpop.f32.mrb[42].mxu0  ;;  %v1748_v36 = vpop.f32.mrb[50].mxu1 }
 0xef5   :  { %v3397_v37 = vpop.f32.mrb[43].mxu0  ;;  %v3403_v38 = vpop.f32.mrb[51].mxu1  ;;  %v2058_v39 = vadd.f32 %v2050_v31, %v4012_v45  ;;  %v2059_v40 = vadd.f32 %v2051_v32, %v4012_v45 }
 0xef7   :  { %v2066_v13 = vsel %vm322_vm6, %v2058_v39, -inf  ;;  %v2069_v41 = vsel %vm322_vm6, %v2059_v40, -inf }
 0xef8   :  { %2067 = vmax.xlane.f32.xlu1 %v2066_v13  ;;  %2070 = vmax.xlane.f32.xlu0 %v2069_v41 }
 0xefa   :  { %v1795_v42 = vpop.f32.mrb[44].mxu0  ;;  %v1845_v43 = vpop.f32.mrb[52].mxu1 }
 0xefb   :  { %v2052_v44 = vmul.f32 0.35355338, %v1795_v42  ;;  %v2053_v46 = vmul.f32 0.35355338, %v1845_v43  ;;  %v3408_v47 = vpop.f32.mrb[45].mxu0  ;;  %v3414_v48 = vpop.f32.mrb[53].mxu1 }
 0xefc   :  { %v1798_v49 = vpop.f32.mrb[46].mxu0  ;;  %v1848_v50 = vpop.f32.mrb[54].mxu1 }
 0xefd   :  { %v3409_v52 = vpop.f32.mrb[47].mxu0  ;;  %v3415_v55 = vpop.f32.mrb[55].mxu1  ;;  %v2060_v23 = vadd.f32 %v2052_v44, %v4012_v45  ;;  %v4322_v56 = vadd.f32 %v2053_v46, %v4012_v45 }
 0xeff   :  { %v2072_v12 = vsel %vm322_vm6, %v2060_v23, -inf  ;;  %v2075_v51 = vsel %vm322_vm6, %v4322_v56, -inf }
 0xf00   :  { %2073 = vmax.xlane.f32.xlu0 %v2072_v12  ;;  %2076 = vmax.xlane.f32.xlu1 %v2075_v51 }
 0xf02   :  { %v1894_v58 = vpop.f32.mrb[48].mxu0  ;;  %v1944_v59 = vpop.f32.mrb[56].mxu1 }
 0xf03   :  { %v2054_v57 = vmul.f32 0.35355338, %v1894_v58  ;;  %v2055_v62 = vmul.f32 0.35355338, %v1944_v59  ;;  %v3420_v63 = vpop.f32.mrb[49].mxu0  ;;  %v3426_v0 = vpop.f32.mrb[57].mxu1 }
 0xf04   :  { %v1897_v3 = vpop.f32.mrb[50].mxu0  ;;  %v1947_v4 = vpop.f32.mrb[58].mxu1 }
 0xf05   :  { %v3421_v5 = vpop.f32.mrb[51].mxu0  ;;  %v3427_v6 = vpop.f32.mrb[59].mxu1  ;;  %v2062_v45 = vadd.f32 %v2054_v57, %v4026_v17  ;;  %v2063_v7 = vadd.f32 %v2055_v62, %v4026_v17 }
 0xf07   :  { %v2078_v8 = vsel %vm322_vm6, %v2062_v45, -inf  ;;  %v2081_v10 = vsel %vm322_vm6, %v2063_v7, -inf }
 0xf08   :  { %2079 = vmax.xlane.f32.xlu0 %v2078_v8  ;;  %2082 = vmax.xlane.f32.xlu1 %v2081_v10 }
 0xf0a   :  { %v1994_v11 = vpop.f32.mrb[52].mxu0  ;;  %v2044_v14 = vpop.f32.mrb[60].mxu1 }
 0xf0b   :  { %v2056_v15 = vmul.f32 0.35355338, %v1994_v11  ;;  %v2057_v16 = vmul.f32 0.35355338, %v2044_v14  ;;  %v3432_v18 = vpop.f32.mrb[53].mxu0  ;;  %v3438_v19 = vpop.f32.mrb[61].mxu1 }
 0xf0c   :  { %v1997_v20 = vpop.f32.mrb[54].mxu0  ;;  %v2047_v21 = vpop.f32.mrb[62].mxu1 }
 0xf0d   :  { %v3433_v22 = vpop.f32.mrb[55].mxu0  ;;  %v3439_v24 = vpop.f32.mrb[63].mxu1  ;;  %v2064_v25 = vadd.f32 %v2056_v15, %v4026_v17  ;;  %v2065_v26 = vadd.f32 %v2057_v16, %v4026_v17 }
 0xf0f   :  { %v2084_v27 = vsel %vm322_vm6, %v2064_v25, -inf  ;;  %v2087_v1 = vsel %vm322_vm6, %v2065_v26, -inf }
 0xf10   :  { %2085 = vmax.xlane.f32.xlu0 %v2084_v27  ;;  %2088 = vmax.xlane.f32.xlu1 %v2087_v1 }
 0xf21   :  { %2256 = vrot.lane.b32.xlu1 %v4233_v60, %s4551_s6 }
 0xf26   :  { %2306 = vrot.lane.b32.xlu0 %v4233_v60, %s4552_s29 }
 0xf85   :  { %v2068_v2 = vpop.xlane.xlu1 %2067  ;;  %v2071_v28 = vpop.xlane.xlu0 %2070 }
 0xf86   :  { %v2090_v29 = vsub.f32 %v2058_v39, %v2068_v2  ;;  %v2091_v30 = vsub.f32 %v2059_v40, %v2071_v28 }
 0xf88   :  { %v2098_v31 = vmul.f32 1.442695, %v2090_v29  ;;  %v2100_v32 = vmul.f32 1.442695, %v2091_v30 }
 0xf8a   :  { %3666 = vpow2.f32 %v2098_v31 }
 0xf8b   :  { %3668 = vpow2.f32 %v2100_v32 }
 0xf8d   :  { %v2074_v17 = vpop.xlane.xlu0 %2073  ;;  %v2077_v40 = vpop.xlane.xlu1 %2076 }
 0xf8e   :  { %v2092_v33 = vsub.f32 %v2060_v23, %v2074_v17  ;;  %v2093_v13 = vsub.f32 %v4322_v56, %v2077_v40 }
 0xf90   :  { %v2102_v34 = vmul.f32 1.442695, %v2092_v33  ;;  %v2104_v42 = vmul.f32 1.442695, %v2093_v13 }
 0xf92   :  { %3670 = vpow2.f32 %v2102_v34 }
 0xf93   :  { %3672 = vpow2.f32 %v2104_v42 }
 0xf94   :  { %v3667_v35 = vpop.eup %3666 }
 0xf95   :  { %v3669_v36 = vpop.eup %3668  ;;  %v2114_v37 = vsel %vm322_vm6, %v3667_v35, 0.0  ;;  %v2083_v41 = vpop.xlane.xlu1 %2082 }
 0xf96   :  { %2115 = vadd.xlane.f32.xlu0 %v2114_v37  ;;  %v2117_v38 = vsel %vm322_vm6, %v3669_v36, 0.0  ;;  %v2080_v43 = vpop.xlane.xlu0 %2079  ;;  %v2095_v44 = vsub.f32 %v2063_v7, %v2083_v41 }
 0xf97   :  { %2118 = vadd.xlane.f32.xlu1 %v2117_v38  ;;  %v2094_v47 = vsub.f32 %v2062_v45, %v2080_v43 }
 0xf98   :  { %v2108_v48 = vmul.f32 1.442695, %v2095_v44 }
 0xf99   :  { %v2106_v52 = vmul.f32 1.442695, %v2094_v47 }
 0xf9a   :  { %3674 = vpow2.f32 %v2108_v48 }
 0xf9b   :  { %3676 = vpow2.f32 %v2106_v52 }
 0xf9c   :  { %v4341_v60 = vpop.eup %3670 }
 0xf9d   :  { %v2120_v39 = vsel %vm322_vm6, %v4341_v60, 0.0  ;;  %v2089_v46 = vpop.xlane.xlu1 %2088  ;;  %v2086_v49 = vpop.xlane.xlu0 %2085 }
 0xf9e   :  { %2121 = vadd.xlane.f32.xlu0 %v2120_v39  ;;  %v2097_v50 = vsub.f32 %v2065_v26, %v2089_v46  ;;  %v2096_v55 = vsub.f32 %v2064_v25, %v2086_v49  ;;  %v3673_v51 = vpop.eup %3672 }
 0xf9f   :  { %v2123_v56 = vsel %vm322_vm6, %v3673_v51, 0.0 }
 0xfa0   :  { %v2112_v23 = vmul.f32 1.442695, %v2097_v50  ;;  %v2110_v12 = vmul.f32 1.442695, %v2096_v55 }
 0xfa1   :  { %v2307_v5 = vpop.permute.xlu0 %2306  ;;  %v2257_v6 = vpop.permute.xlu1 %2256 }
 0xfa2   :  { %3678 = vpow2.f32 %v2112_v23  ;;  %v2262_v16 = vsel %vm106_vm0, %v2257_v6, 0 }
 0xfa3   :  { %3680 = vpow2.f32 %v2110_v12 }
 0xfa4   :  { %v4351_v58 = vpop.eup %3674 }
 0xfa5   :  { %v4353_v59 = vpop.eup %3676  ;;  %v2129_v57 = vsel %vm322_vm6, %v4351_v58, 0.0 }
 0xfa6   :  { %v2126_v63 = vsel %vm322_vm6, %v4353_v59, 0.0 }
 0xfa8   :  { %2369 = vrot.lane.b32.xlu1 %v4248_v61, %s4550_s8 }
 0xfac   :  { %v4357_v62 = vpop.eup %3678 }
 0xfad   :  { %v4361_v0 = vpop.eup %3680  ;;  %v2135_v3 = vsel %vm322_vm6, %v4357_v62, 0.0 }
 0xfae   :  { %v2132_v4 = vsel %vm322_vm6, %v4361_v0, 0.0 }
 0xfb4   :  { %2419 = vrot.lane.b32.xlu0 %v4248_v61, %s3722_s25  ;;  %s4554_s25 = smov 16  }
 0xfcc   :  { %2124 = vadd.xlane.f32.xlu1 %v2123_v56 }
 0xfd0   :  { %2130 = vadd.xlane.f32.xlu1 %v2129_v57 }
 0xfd3   :  { %2127 = vadd.xlane.f32.xlu0 %v2126_v63 }
 0xfd4   :  { %2136 = vadd.xlane.f32.xlu1 %v2135_v3 }
 0xfd7   :  { %2133 = vadd.xlane.f32.xlu0 %v2132_v4  ;;  %v3608_v4 = vld [vmem:[%s4513_s9 + $0x10] sm:$0xff]  }
 0xfe5   :  { %2467 = vrot.lane.b32.xlu1 %v4248_v61, %s4551_s6 }
 0xfed   :  { %2517 = vrot.lane.b32.xlu0 %v4248_v61, %s4552_s29  ;;  %v2312_v61 = vsel %vm106_vm0, %v2307_v5, 0 }
0x1023   :  { %v2116_v45 = vpop.xlane.xlu0 %2115 }
0x1024   :  { %3682 = vrcp.f32 %v2116_v45  ;;  %v2119_v7 = vpop.xlane.xlu1 %2118  ;;  %v3609_v45 = vld [vmem:[%s4513_s9 + $0x18] sm:$0xff]   ;;  %s4555_s9 = smov 24  }
0x1025   :  { %3684 = vrcp.f32 %v2119_v7 }
0x1028   :  { %v2370_v19 = vpop.permute.xlu1 %2369 }
0x1029   :  { %v2375_v32 = vsel %vm106_vm0, %v2370_v19, 0 }
0x102b   :  { %v2122_v20 = vpop.xlane.xlu0 %2121 }
0x102c   :  { %3686 = vrcp.f32 %v2122_v20 }
0x102e   :  { %v3683_v8 = vpop.eup %3682 }
0x102f   :  { %v3685_v10 = vpop.eup %3684  ;;  %v2146_v11 = vmul.f32 %v3683_v8, %v3667_v35  ;;  %v2420_v22 = vpop.permute.xlu0 %2419 }
0x1030   :  { %v2147_v14 = vmul.f32 %v3685_v10, %v3669_v36  ;;  %v2425_v34 = vsel %vm106_vm0, %v2420_v22, 0 }
0x1032   :  { %v2154_v15 = vpack.c.bf16 %v2147_v14, %v2146_v11 }
0x1034   :  { %3443 = vmatmul.mubr.msk.bf16.vlgmr.msra.gmra.mrb[56].mxu0 %vm322_vm6, %v2154_v15  ;;  %v2207_v18 = vrot.slane %v2154_v15, 4 }
0x1035   :  { %3453 = vmatpush3.bf16.msra.mxu0 %v2262_v16  ;;  %3454 = vmatprep.mubr.msk.bf16.mxu0 %vm3712_vm5, %v3711_v9 }
0x1036   :  { %3449 = vmatmul.mubr.msk.bf16.vlgmr.msra.gmra.mrb[64].mxu1 %vm322_vm6, %v2207_v18  ;;  %3464 = vmatprep.subr.bf16.mxu0 %v3711_v9  ;;  %v3687_v26 = vpop.eup %3686 }
0x1037   :  { %3459 = vmatpush3.bf16.msra.mxu1 %v2312_v61  ;;  %3460 = vmatprep.mubr.msk.bf16.mxu1 %vm3712_vm5, %v3711_v9  ;;  %v2148_v28 = vmul.f32 %v3687_v26, %v4341_v60 }
0x1038   :  { %3470 = vmatprep.subr.bf16.mxu1 %v3711_v9 }
0x1059   :  { %v2125_v21 = vpop.xlane.xlu1 %2124 }
0x105a   :  { %3688 = vrcp.f32 %v2125_v21 }
0x105d   :  { %v2131_v24 = vpop.xlane.xlu1 %2130 }
0x105e   :  { %3690 = vrcp.f32 %v2131_v24 }
0x1060   :  { %v2128_v25 = vpop.xlane.xlu0 %2127 }
0x1061   :  { %3692 = vrcp.f32 %v2128_v25  ;;  %v2137_v27 = vpop.xlane.xlu1 %2136 }
0x1064   :  { %v3689_v1 = vpop.eup %3688  ;;  %v2134_v2 = vpop.xlane.xlu0 %2133 }
0x1065   :  { %v2149_v29 = vmul.f32 %v3689_v1, %v3673_v51  ;;  %3694 = vrcp.f32 %v2134_v2  ;;  %v2468_v37 = vpop.permute.xlu1 %2467 }
0x1066   :  { %3696 = vrcp.f32 %v2137_v27  ;;  %v2473_v42 = vsel %vm106_vm0, %v2468_v37, 0 }
0x1067   :  { %v2155_v30 = vpack.c.bf16 %v2149_v29, %v2148_v28 }
0x1068   :  { %v3691_v31 = vpop.eup %3690  ;;  %v2518_v40 = vpop.permute.xlu0 %2517 }
0x1069   :  { %3455 = vmatmul.mubr.msk.bf16.vlgmr.msra.gmra.mrb[60].mxu0 %vm322_vm6, %v2155_v30  ;;  %v2305_v17 = vrot.slane %v2155_v30, 4  ;;  %v2151_v35 = vmul.f32 %v3691_v31, %v4351_v58  ;;  %v2523_v44 = vsel %vm106_vm0, %v2518_v40, 0  ;;  %v3073_v40 = vld [vmem:[%s4514_s10 + $0x1] ss:$0 sm:$0xff] }
0x106a   :  { %3465 = vmatpush3.bf16.msra.mxu0 %v2375_v32  ;;  %3466 = vmatprep.mubr.msk.bf16.mxu0 %vm3712_vm5, %v3711_v9 }
0x106b   :  { %v3693_v33 = vpop.eup %3692  ;;  %3461 = vmatmul.mubr.msk.bf16.vlgmr.msra.gmra.mrb[68].mxu1 %vm322_vm6, %v2305_v17  ;;  %3476 = vmatprep.subr.bf16.mxu0 %v3711_v9 }
0x106c   :  { %v2150_v36 = vmul.f32 %v3693_v33, %v4353_v59  ;;  %3471 = vmatpush3.bf16.msra.mxu1 %v2425_v34  ;;  %3472 = vmatprep.mubr.msk.bf16.mxu1 %vm3712_vm5, %v3711_v9 }
0x106d   :  { %3482 = vmatprep.subr.bf16.mxu1 %v3711_v9 }
0x106e   :  { %v2156_v38 = vpack.c.bf16 %v2151_v35, %v2150_v36 }
0x106f   :  { %v3695_v60 = vpop.eup %3694 }
0x1070   :  { %v3697_v39 = vpop.eup %3696  ;;  %v2418_v13 = vrot.slane %v2156_v38, 4  ;;  %v2152_v41 = vmul.f32 %v3695_v60, %v4361_v0 }
0x1071   :  { %3467 = vmatmul.mubr.msk.bf16.vlgmr.msra.gmra.mrb[64].mxu0 %vm322_vm6, %v2156_v38  ;;  %v2153_v43 = vmul.f32 %v3697_v39, %v4357_v62 }
0x1072   :  { %3477 = vmatpush3.bf16.msra.mxu0 %v2473_v42  ;;  %3478 = vmatprep.mubr.msk.bf16.mxu0 %vm3712_vm5, %v3711_v9 }
0x1073   :  { %3473 = vmatmul.mubr.msk.bf16.vlgmr.msra.gmra.mrb[72].mxu1 %vm322_vm6, %v2418_v13  ;;  %3488 = vmatprep.subr.bf16.mxu0 %v3711_v9  ;;  %v2157_v46 = vpack.c.bf16 %v2153_v43, %v2152_v41 }
0x1074   :  { %3483 = vmatpush3.bf16.msra.mxu1 %v2523_v44  ;;  %3484 = vmatprep.mubr.msk.bf16.mxu1 %vm3712_vm5, %v3711_v9 }
0x1075   :  { %3496 = vmatprep.subr.bf16.mxu1 %v3711_v9  ;;  %v2516_v47 = vrot.slane %v2157_v46, 4 }
0x1079   :  { %3479 = vmatmul.mubr.msk.bf16.vlgmr.msra.gmra.mrb[68].mxu0 %vm322_vm6, %v2157_v46 }
0x107a   :  { %3492 = vmatprep.mubr.msk.bf16.mxu0 %vm3712_vm5, %v3711_v9  ;;  %3489 = vmatpush3.bf16.msra.mxu0 %v3608_v4 }
0x107b   :  { %3485 = vmatmul.mubr.msk.bf16.vlgmr.msra.gmra.mrb[76].mxu1 %vm322_vm6, %v2516_v47  ;;  %3490 = vmatprep.subr.bf16.mxu0 %v3711_v9 }
0x107c   :  { %3500 = vmatprep.mubr.msk.bf16.mxu1 %vm3712_vm5, %v3711_v9 }
0x107e   :  { %3491 = vmatpush3.bf16.msra.mxu0 %v3609_v45 }
0x107f   :  { %3504 = vmatprep.subr.bf16.mxu0 %v3711_v9 }
0x1107   :  { %v2200_v48 = vpop.f32.mrb[56].mxu0 }
0x1108   :  { %v3444_v49 = vpop.f32.mrb[57].mxu0 }
0x1109   :  { %v2203_v50 = vpop.f32.mrb[58].mxu0  ;;  %v2250_v52 = vpop.f32.mrb[64].mxu1 }
0x110a   :  { %v3445_v55 = vpop.f32.mrb[59].mxu0  ;;  %v3450_v23 = vpop.f32.mrb[65].mxu1 }
0x110b   :  { %v2253_v12 = vpop.f32.mrb[66].mxu1 }
0x110c   :  { %v3451_v51 = vpop.f32.mrb[67].mxu1 }
0x113c   :  { %v2298_v56 = vpop.f32.mrb[60].mxu0 }
0x113d   :  { %v3456_v58 = vpop.f32.mrb[61].mxu0 }
0x113e   :  { %v2301_v59 = vpop.f32.mrb[62].mxu0  ;;  %v2348_v57 = vpop.f32.mrb[68].mxu1 }
0x113f   :  { %v3457_v62 = vpop.f32.mrb[63].mxu0  ;;  %v3462_v63 = vpop.f32.mrb[69].mxu1 }
0x1140   :  { %v2351_v0 = vpop.f32.mrb[70].mxu1  ;;  %v3611_v62 = vld [vmem:[%s4515_s13 + $0x18] sm:$0xff]  }
0x1141   :  { %v3463_v3 = vpop.f32.mrb[71].mxu1 }
0x1144   :  { %v2411_v5 = vpop.f32.mrb[64].mxu0 }
0x1145   :  { %v3468_v6 = vpop.f32.mrb[65].mxu0 }
0x1146   :  { %v2414_v7 = vpop.f32.mrb[66].mxu0  ;;  %v2461_v8 = vpop.f32.mrb[72].mxu1 }
0x1147   :  { %v3581_v10 = vpack.i.bf16 %v2461_v8, %v2250_v52  ;;  %v3469_v11 = vpop.f32.mrb[67].mxu0  ;;  %v3474_v14 = vpop.f32.mrb[73].mxu1  ;;  %v3079_v8 = vld [vmem:[%s4516_s11 + $0x1] ss:$0 sm:$0xff] }
0x1148   :  { %v2464_v15 = vpop.f32.mrb[74].mxu1 }
0x1149   :  { %3582 = vrot.lane.b32.xlu1 %v3581_v10, %s4553_s23  ;;  %v3475_v16 = vpop.f32.mrb[75].mxu1  ;;  %v3080_v15 = vld [vmem:[%s4517_s12 + $0x1] ss:$0 sm:$0xff] }
0x114c   :  { %v2509_v18 = vpop.f32.mrb[68].mxu0 }
0x114d   :  { %v3586_v61 = vpack.i.bf16 %v2509_v18, %v2298_v56  ;;  %v3480_v19 = vpop.f32.mrb[69].mxu0 }
0x114e   :  { %v2512_v20 = vpop.f32.mrb[70].mxu0  ;;  %v2559_v21 = vpop.f32.mrb[76].mxu1 }
0x114f   :  { %v3591_v22 = vpack.i.bf16 %v2559_v21, %v2348_v57  ;;  %3587 = vrot.lane.b32.xlu0 %v3586_v61, %s4554_s25  ;;  %v3481_v24 = vpop.f32.mrb[71].mxu0  ;;  %v3486_v25 = vpop.f32.mrb[77].mxu1  ;;  %v3612_v20 = vld [vmem:[%s4518_s15 + $0x20] sm:$0xff]   ;;  %v3613_v21 = vld [vmem:[%s4518_s15 + $0x28] sm:$0xff]  }
0x1150   :  { %v2562_v26 = vpop.f32.mrb[78].mxu1  ;;  %v3615_v24 = vld [vmem:[%s4518_s15 + $0x38] sm:$0xff]   ;;  %v3086_v25 = vld [vmem:[%s4519_s14 + $0x1] ss:$0 sm:$0xff] }
0x1151   :  { %3592 = vrot.lane.b32.xlu1 %v3591_v22, %s4555_s9  ;;  %v3487_v27 = vpop.f32.mrb[79].mxu1  ;;  %v3614_v22 = vld [vmem:[%s4518_s15 + $0x30] sm:$0xff]  }
0x11bb   :  { %v3583_v1 = vpop.permute.xlu1 %3582 }
0x11bc   :  { %v3585_v2 = vunpack.i.h.bf16 %v3583_v1  ;;  %v3584_v28 = vunpack.i.l.bf16 %v3583_v1 }
0x11be   :  { %v2577_v32 = vsel %vm322_vm6, %v2411_v5, %v3585_v2  ;;  %v2366_v17 = vsel %vm322_vm6, %v2200_v48, %v3584_v28 }
0x11c1   :  { %v3588_v29 = vpop.permute.xlu0 %3587 }
0x11c2   :  { %v3590_v30 = vunpack.i.h.bf16 %v3588_v29  ;;  %v3589_v31 = vunpack.i.l.bf16 %v3588_v29 }
0x11c3   :  { %v3593_v33 = vpop.permute.xlu1 %3592 }
0x11c4   :  { %v2367_v34 = vsel %vm1035_vm7, %v2366_v17, %v3589_v31  ;;  %v2578_v35 = vsel %vm1035_vm7, %v2577_v32, %v3590_v30  ;;  %v3595_v36 = vunpack.i.h.bf16 %v3593_v33  ;;  %v3594_v37 = vunpack.i.l.bf16 %v3593_v33 }
0x11c6   :  { %v2579_v38 = vsel %vm1037_vm8, %v2578_v35, %v3595_v36  ;;  %v2368_v60 = vsel %vm1037_vm8, %v2367_v34, %v3594_v37 }
0x11c7   :  { %v2580_v39 = vpack.c.bf16 %v2579_v38, %v2368_v60 }
0x11c9   :  { %3493 = vmatmul.mubr.msk.bf16.vlgmr.msra.gmra.mrb[72].mxu0 %vm194_vm4, %v2580_v39 }
0x11ca   :  { %3512 = vmatprep.mubr.msk.bf16.mxu0 %vm3712_vm5, %v3711_v9  ;;  %3505 = vmatpush3.bf16.msra.mxu0 %v3612_v20 }
0x11cb   :  { %3506 = vmatprep.subr.bf16.mxu0 %v3711_v9 }
0x11ce   :  { %3507 = vmatpush3.bf16.msra.mxu0 %v3613_v21 }
0x11cf   :  { %3508 = vmatprep.subr.bf16.mxu0 %v3711_v9 }
0x11d2   :  { %3509 = vmatpush3.bf16.msra.mxu0 %v3614_v22  ;;  %v3108_v22 = vld [vmem:[%s4522_s18 + $0x1] ss:$0 sm:$0xff] }
0x11d3   :  { %3510 = vmatprep.subr.bf16.mxu0 %v3711_v9 }
0x11d6   :  { %3511 = vmatpush3.bf16.msra.mxu0 %v3615_v24 }
0x129c   :  { %v2643_v13 = vpop.f32.mrb[72].mxu0 }
0x129d   :  { %v2644_v41 = vadd.f32 %v3073_v40, %v2643_v13  ;;  %v3494_v42 = vpop.f32.mrb[73].mxu0 }
0x129e   :  { %v2646_v43 = vpop.f32.mrb[74].mxu0 }
0x129f   :  { %v2647_v44 = vadd.f32 %v3073_v40, %v2646_v43  ;;  %v3495_v46 = vpop.f32.mrb[75].mxu0  ;;  %v2650_v47 = vadd.f32 %v2644_v41, %v4221_v53 }
0x12a1   :  { %v2651_v48 = vadd.f32 %v2647_v44, %v4223_v54  ;;  %v2656_v49 = vsel %vm194_vm4, %v2650_v47, 0.0  ;;  %v3610_v54 = vld [vmem:[%s4515_s13 + $0x10] sm:$0xff]  }
0x12a2   :  { %2657 = vadd.xlane.f32.xlu0 %v2656_v49  ;;  %3497 = vmatpush3.bf16.msra.mxu1 %v3610_v54 }
0x12a3   :  { %v2659_v50 = vsel %vm194_vm4, %v2651_v48, 0.0  ;;  %3498 = vmatprep.subr.bf16.mxu1 %v3711_v9 }
0x12a4   :  { %2660 = vadd.xlane.f32.xlu1 %v2659_v50 }
0x12a6   :  { %3499 = vmatpush3.bf16.msra.mxu1 %v3611_v62 }
0x12a7   :  { %3516 = vmatprep.subr.bf16.mxu1 %v3711_v9 }
0x132f   :  { %v2658_v52 = vpop.xlane.xlu0 %2657 }
0x1330   :  { %v2662_v55 = vmul.f32 0.03125, %v2658_v52 }
0x1331   :  { %v2661_v23 = vpop.xlane.xlu1 %2660 }
0x1332   :  { %v2664_v12 = vsub.f32 %v2650_v47, %v2662_v55  ;;  %v2663_v51 = vmul.f32 0.03125, %v2661_v23  ;;  %v3099_v47 = vld [vmem:[%s4520_s16 + $0x1] ss:$0 sm:$0xff] }
0x1334   :  { %v2665_v56 = vsub.f32 %v2651_v48, %v2663_v51  ;;  %v2666_v58 = vmul.f32 %v2664_v12, %v2664_v12 }
0x1336   :  { %v2668_v59 = vsel %vm194_vm4, %v2666_v58, 0.0  ;;  %v2667_v57 = vmul.f32 %v2665_v56, %v2665_v56 }
0x1337   :  { %2669 = vadd.xlane.f32.xlu0 %v2668_v59 }
0x1338   :  { %v2671_v53 = vsel %vm194_vm4, %v2667_v57, 0.0 }
0x133b   :  { %2672 = vadd.xlane.f32.xlu0 %v2671_v53 }
0x13c4   :  { %v2670_v63 = vpop.xlane.xlu0 %2669 }
0x13c5   :  { %v2674_v0 = vmul.f32 0.03125, %v2670_v63 }
0x13c7   :  { %v2676_v3 = vadd.f32 1e-12, %v2674_v0 }
0x13c8   :  { %v2673_v4 = vpop.xlane.xlu0 %2672 }
0x13c9   :  { %3698 = vrsqrt.f32 %v2676_v3  ;;  %v2675_v5 = vmul.f32 0.03125, %v2673_v4 }
0x13cb   :  { %v2677_v6 = vadd.f32 1e-12, %v2675_v5 }
0x13cd   :  { %3700 = vrsqrt.f32 %v2677_v6  ;;  %v3616_v6 = vld [vmem:[%s4523_s19] sm:$0xff]  }
0x13d3   :  { %v3699_v45 = vpop.eup %3698 }
0x13d4   :  { %v2680_v7 = vmul.f32 %v3699_v45, %v2664_v12  ;;  %v3617_v45 = vld [vmem:[%s4523_s19 + $0x8] sm:$0xff]  }
0x13d6   :  { %v2688_v11 = vmul.f32 %v3079_v8, %v2680_v7 }
0x13d7   :  { %v3701_v10 = vpop.eup %3700 }
0x13d8   :  { %v2681_v14 = vmul.f32 %v3701_v10, %v2665_v56  ;;  %v2696_v18 = vadd.f32 %v3080_v15, %v2688_v11 }
0x13da   :  { %v2689_v16 = vmul.f32 %v3079_v8, %v2681_v14 }
0x13dc   :  { %v2697_v61 = vadd.f32 %v3080_v15, %v2689_v16 }
0x13de   :  { %v2698_v19 = vpack.c.bf16 %v2697_v61, %v2696_v18 }
0x13e0   :  { %3501 = vmatmul.mubr.msk.bf16.vlgmr.msra.gmra.mrb[80].mxu1 %vm194_vm4, %v2698_v19 }
0x13e1   :  { %3520 = vmatprep.mubr.msk.bf16.mxu1 %vm3712_vm5, %v3711_v9  ;;  %3517 = vmatpush3.bf16.msra.mxu1 %v3616_v6 }
0x13e2   :  { %3518 = vmatprep.subr.bf16.mxu1 %v3711_v9  ;;  %v3107_v9 = vld [vmem:[%s4521_s17 + $0x1] ss:$0 sm:$0xff] }
0x13e5   :  { %3519 = vmatpush3.bf16.msra.mxu1 %v3617_v45 }
0x14b3   :  { %v2761_v26 = vpop.f32.mrb[80].mxu1 }
0x14b4   :  { %v2762_v27 = vadd.f32 %v3086_v25, %v2761_v26  ;;  %v3502_v1 = vpop.f32.mrb[81].mxu1 }
0x14b5   :  { %v2764_v2 = vpop.f32.mrb[82].mxu1 }
0x14b6   :  { %v2770_v28 = vmul.f32 0.044715, %v2762_v27  ;;  %v2765_v29 = vadd.f32 %v3086_v25, %v2764_v2  ;;  %v3503_v30 = vpop.f32.mrb[83].mxu1  ;;  %v2768_v13 = vmul.f32 0.5, %v2762_v27  ;;  %v3109_v2 = vld [vmem:[%s4524_s20] ss:$0 sm:$0xff] }
0x14b8   :  { %v2772_v31 = vmul.f32 %v2770_v28, %v2762_v27  ;;  %v2771_v32 = vmul.f32 0.044715, %v2765_v29  ;;  %v2769_v41 = vmul.f32 0.5, %v2765_v29 }
0x14ba   :  { %v2774_v17 = vmul.f32 %v2772_v31, %v2762_v27  ;;  %v2773_v33 = vmul.f32 %v2771_v32, %v2765_v29 }
0x14bc   :  { %v2776_v34 = vadd.f32 %v2774_v17, %v2762_v27  ;;  %v2775_v35 = vmul.f32 %v2773_v33, %v2765_v29 }
0x14be   :  { %v2778_v36 = vmul.f32 0.7978846, %v2776_v34  ;;  %v2777_v37 = vadd.f32 %v2775_v35, %v2765_v29 }
0x14c0   :  { %3702 = vtanh.f32 %v2778_v36  ;;  %v2779_v38 = vmul.f32 0.7978846, %v2777_v37 }
0x14c2   :  { %3704 = vtanh.f32 %v2779_v38 }
0x14ca   :  { %v3703_v60 = vpop.eup %3702 }
0x14cb   :  { %v2782_v39 = vadd.f32 1.0, %v3703_v60 }
0x14cc   :  { %v3705_v40 = vpop.eup %3704 }
0x14cd   :  { %v2783_v42 = vadd.f32 1.0, %v3705_v40  ;;  %v2784_v43 = vmul.f32 %v2782_v39, %v2768_v13 }
0x14cf   :  { %v2785_v44 = vmul.f32 %v2783_v42, %v2769_v41 }
0x14d1   :  { %v2786_v46 = vpack.c.bf16 %v2785_v44, %v2784_v43 }
0x14d3   :  { %3513 = vmatmul.mubr.msk.bf16.vlgmr.msra.gmra.mrb[76].mxu0 %vm1490_vm9, %v2786_v46 }
0x15a6   :  { %v2865_v48 = vpop.f32.mrb[76].mxu0 }
0x15a7   :  { %v2866_v49 = vadd.f32 %v3099_v47, %v2865_v48  ;;  %v3514_v50 = vpop.f32.mrb[77].mxu0 }
0x15a8   :  { %v2868_v52 = vpop.f32.mrb[78].mxu0 }
0x15a9   :  { %v2869_v55 = vadd.f32 %v3099_v47, %v2868_v52  ;;  %v3515_v23 = vpop.f32.mrb[79].mxu0  ;;  %v2872_v12 = vadd.f32 %v2866_v49, %v2696_v18 }
0x15ab   :  { %v2873_v51 = vadd.f32 %v2869_v55, %v2697_v61  ;;  %v2878_v56 = vsel %vm194_vm4, %v2872_v12, 0.0 }
0x15ac   :  { %2879 = vadd.xlane.f32.xlu0 %v2878_v56 }
0x15ad   :  { %v2881_v58 = vsel %vm194_vm4, %v2873_v51, 0.0 }
0x15ae   :  { %2882 = vadd.xlane.f32.xlu1 %v2881_v58 }
0x1639   :  { %v2880_v59 = vpop.xlane.xlu0 %2879 }
0x163a   :  { %v2884_v57 = vmul.f32 0.03125, %v2880_v59 }
0x163b   :  { %v2883_v53 = vpop.xlane.xlu1 %2882 }
0x163c   :  { %v2886_v54 = vsub.f32 %v2872_v12, %v2884_v57  ;;  %v2885_v62 = vmul.f32 0.03125, %v2883_v53 }
0x163e   :  { %v2887_v63 = vsub.f32 %v2873_v51, %v2885_v62  ;;  %v2888_v0 = vmul.f32 %v2886_v54, %v2886_v54 }
0x1640   :  { %v2890_v3 = vsel %vm194_vm4, %v2888_v0, 0.0  ;;  %v2889_v4 = vmul.f32 %v2887_v63, %v2887_v63 }
0x1641   :  { %2891 = vadd.xlane.f32.xlu0 %v2890_v3 }
0x1642   :  { %v2893_v5 = vsel %vm194_vm4, %v2889_v4, 0.0 }
0x1643   :  { %2894 = vadd.xlane.f32.xlu1 %v2893_v5 }
0x16ce   :  { %v2892_v7 = vpop.xlane.xlu0 %2891 }
0x16cf   :  { %v2896_v8 = vmul.f32 0.03125, %v2892_v7 }
0x16d0   :  { %v2895_v10 = vpop.xlane.xlu1 %2894 }
0x16d1   :  { %v2898_v11 = vadd.f32 1e-12, %v2896_v8  ;;  %v2897_v14 = vmul.f32 0.03125, %v2895_v10 }
0x16d3   :  { %3706 = vrsqrt.f32 %v2898_v11  ;;  %v2899_v15 = vadd.f32 1e-12, %v2897_v14 }
0x16d5   :  { %3708 = vrsqrt.f32 %v2899_v15 }
0x16dd   :  { %v3707_v16 = vpop.eup %3706 }
0x16de   :  { %v2902_v18 = vmul.f32 %v3707_v16, %v2886_v54 }
0x16df   :  { %v3709_v61 = vpop.eup %3708 }
0x16e0   :  { %v2903_v19 = vmul.f32 %v3709_v61, %v2887_v63  ;;  %v2910_v20 = vmul.f32 %v3107_v9, %v2902_v18 }
0x16e2   :  { %v2911_v21 = vmul.f32 %v3107_v9, %v2903_v19  ;;  %v2918_v25 = vadd.f32 %v3108_v22, %v2910_v20 }
0x16e4   :  { %v2919_v24 = vadd.f32 %v3108_v22, %v2911_v21 }
0x16e6   :  { %v2921_v26 = vrot.slane %v2919_v24, 7 }
0x16e8   :  { %v2924_v27 = vsel %vm2923_vm10, %v2918_v25, %v2921_v26 }
0x16e9   :  { %v2925_v1 = vpack.c.bf16 %v2924_v27, %v2924_v27 }
0x16eb   :  { %3521 = vmatmul.mubr.msk.bf16.vlgmr.msra.gmra.mrb[84].mxu1 %vm194_vm4, %v2925_v1 }
0x17be   :  { %v2986_v28 = vpop.f32.mrb[84].mxu1 }
0x17bf   :  { %v2987_v29 = vadd.f32 %v3109_v2, %v2986_v28  ;;  %v3522_v30 = vpop.f32.mrb[85].mxu1 }
0x17c0   :  { %v2989_v31 = vpop.f32.mrb[86].mxu1 }
0x17c1   :  { %2992 = vst [vmem:[%s4525_s21] sm:$0x3] %v2987_v29  ;;  %v3523_v32 = vpop.f32.mrb[87].mxu1 }

</bundles_post_ra>
